<compile_context>
chip_gen: v5e
topology: v5e:2x2
jax: 0.10.0
libtpu: 0.0.40
codegen_flags: <defaults>
</compile_context>

<pallas_src>
import jax
import jax.numpy as jnp
from jax.experimental import pallas as pl
from jax.experimental.pallas import tpu as pltpu


def _linear_kernel(x_ref, w_ref, b_ref, o_ref):
    """One K-step of logits = x @ W_t + b (single step in the default config).

    x_ref: (B, tk)      f32 input tile (cast to bf16 in-kernel for the MXU)
    w_ref: (tk, C_pad)  bf16 pre-transposed weight tile
    b_ref: (1, C_pad)   f32 bias
    o_ref: (B, C_pad)   f32 output block, resident across the K axis
    """
    k = pl.program_id(0)

    # Fold the bias into the init of the resident output block.
    @pl.when(k == 0)
    def _():
        o_ref[...] = jnp.broadcast_to(b_ref[...], o_ref.shape)

    # In-kernel bf16 cast of x (tiny, hidden under the weight DMA), then
    # bf16 x bf16 MXU matmul with f32 accumulation directly into o_ref.
    o_ref[...] += jnp.dot(
        x_ref[...].astype(jnp.bfloat16),
        w_ref[...],
        preferred_element_type=jnp.float32,
    )


def prepare_places_linear_params(w, b):
    """One-time parameter prep (do NOT redo per forward call).

    w: (C, K) f32 PyTorch-layout weight (nn.Linear.weight)
    b: (C,)   f32 bias
    Returns:
      w_t_bf16: (K, C_pad)  bf16 transposed, lane-padded weight
      b_pad2:   (1, C_pad)  f32  padded bias, already 2-D for the kernel
    """
    C, K = w.shape
    C_pad = ((C + 127) // 128) * 128
    w_t_bf16 = (
        jnp.zeros((K, C_pad), jnp.bfloat16)
        .at[:, :C]
        .set(w.T.astype(jnp.bfloat16))
    )
    b_pad2 = jnp.zeros((1, C_pad), jnp.float32).at[0, :C].set(b)
    return w_t_bf16, b_pad2


def places_linear(x, w_t_bf16, b_pad2, classes, *, tk=None, return_padded=False):
    """logits = x @ W.T + b  via Pallas.

    x:        (B, K)      f32 input (cast to bf16 inside the kernel)
    w_t_bf16: (K, C_pad)  bf16 pre-transposed, pre-padded weight
    b_pad2:   (1, C_pad)  f32 pre-padded bias
    classes:  true number of output classes
    tk:       K-tile size. Default None -> tk = K (single grid step).
              On v5e, tk = K // 2 gives 2 steps so the 2nd weight DMA can
              hide the 1st matmul+store.
    """
    B, K = x.shape
    Kw, C_pad = w_t_bf16.shape
    assert Kw == K
    if tk is None:
        tk = K
    assert K % tk == 0, "K must be divisible by tk"

    logits_padded = pl.pallas_call(
        _linear_kernel,
        out_shape=jax.ShapeDtypeStruct((B, C_pad), jnp.float32),
        grid_spec=pltpu.PrefetchScalarGridSpec(
            num_scalar_prefetch=0,
            grid=(K // tk,),  # K reduction only; C is full-width (lane-dense)
            in_specs=[
                pl.BlockSpec((B, tk), lambda k: (0, k)),       # x: K tiles
                pl.BlockSpec((tk, C_pad), lambda k: (k, 0)),   # W_t: K tiles
                pl.BlockSpec((1, C_pad), lambda k: (0, 0)),    # bias: whole
            ],
            out_specs=pl.BlockSpec((B, C_pad), lambda k: (0, 0)),  # resident
        ),
        compiler_params=pltpu.CompilerParams(
            # Single reduction axis; must be "arbitrary" (output resident).
            dimension_semantics=("arbitrary",),
        ),
    )(x, w_t_bf16, b_pad2)

    if return_padded:
        return logits_padded  # consumer slices/masks; avoids an extra HLO op
    return logits_padded[:, :classes]


if __name__ == "__main__":
    # nn.Linear(2048, classes); Places365-style classes=365 exercises the
    # lane-padding path (365 -> 384). Small batch.
    B, K, C = 8, 2048, 365

    key = jax.random.PRNGKey(0)
    kx, kw, kb = jax.random.split(key, 3)

    x = jax.random.normal(kx, (B, K), dtype=jnp.float32)
    # PyTorch nn.Linear weight shape is (classes, 2048).
    w = jax.random.normal(kw, (C, K), dtype=jnp.float32) * (1.0 / jnp.sqrt(K))
    b = jax.random.normal(kb, (C,), dtype=jnp.float32) * 0.01

    # One-time prep: transpose + bf16 cast + lane padding + bias reshape
    # (persistent params, not redone per forward call).
    w_t_bf16, b_pad2 = prepare_places_linear_params(w, b)

    # Default config: single grid step (tk = K), full-width C.
    logits = places_linear(x, w_t_bf16, b_pad2, C)
    logits = jax.block_until_ready(logits)

    # Also exercise the 2-K-step variant (the v5e-oriented config).
    logits2 = places_linear(x, w_t_bf16, b_pad2, C, tk=K // 2)
    logits2 = jax.block_until_ready(logits2)

    # Reference with the SAME bf16-quantized operands (quantization is an
    # intentional perf choice, so compare apples to apples).
    x_q = x.astype(jnp.bfloat16).astype(jnp.float32)
    w_q = w.astype(jnp.bfloat16).astype(jnp.float32)
    ref = x_q @ w_q.T + b

    assert logits.shape == (B, C)
    assert jnp.allclose(logits, ref, atol=2e-3, rtol=1e-2), (
        float(jnp.max(jnp.abs(logits - ref)))
    )
    assert jnp.allclose(logits2, ref, atol=2e-3, rtol=1e-2), (
        float(jnp.max(jnp.abs(logits2 - ref)))
    )

    print("KERNEL_OK")
</pallas_src>

<mosaic_0001>
module attributes {stable_mosaic.version = 11 : i64} {
  func.func @_linear_kernel(%arg0: i32, %arg1: memref<8x2048xf32, #tpu.memory_space<vmem>>, %arg2: memref<2048x384xbf16, #tpu.memory_space<vmem>>, %arg3: memref<1x384xf32, #tpu.memory_space<vmem>>, %arg4: memref<8x384xf32, #tpu.memory_space<vmem>>) attributes {dimension_semantics = [#tpu.dimension_semantics<arbitrary>], iteration_bounds = array<i64: 1>, scalar_prefetch = 0 : i64, scratch_operands = 0 : i64, tpu.core_type = #tpu.core_type<tc>, window_params = [{transform_indices = @transform_0, window_bounds = array<i64: 8, 2048>}, {transform_indices = @transform_1, window_bounds = array<i64: 2048, 384>}, {pipeline_mode = #tpu.pipeline_mode<synchronous>, transform_indices = @transform_2, window_bounds = array<i64: 1, 384>}, {pipeline_mode = #tpu.pipeline_mode<synchronous>, transform_indices = @transform_3, window_bounds = array<i64: 8, 384>}]} {
    %c0_i32 = arith.constant 0 : i32
    %0 = arith.cmpi eq, %arg0, %c0_i32 : i32
    %1 = arith.extui %0 : i1 to i32
    %c0_i32_0 = arith.constant 0 : i32
    %2 = arith.cmpi ne, %1, %c0_i32_0 : i32
    scf.if %2 {
      %c0_8 = arith.constant 0 : index
      %c0_9 = arith.constant 0 : index
      %10 = vector.load %arg3[%c0_8, %c0_9] : memref<1x384xf32, #tpu.memory_space<vmem>>, vector<1x384xf32>
      %11 = vector.shape_cast %10 : vector<1x384xf32> to vector<1x384xf32>
      %12 = vector.broadcast %11 : vector<1x384xf32> to vector<8x384xf32>
      %c0_10 = arith.constant 0 : index
      %c0_11 = arith.constant 0 : index
      %13 = vector.load %arg4[%c0_10, %c0_11] : memref<8x384xf32, #tpu.memory_space<vmem>>, vector<8x384xf32>
      tpu.vector_store %arg4[%c0_10, %c0_11], %12 {strides = array<i32>} : memref<8x384xf32, #tpu.memory_space<vmem>>, vector<8x384xf32>,
    } else {
    }
    %c0 = arith.constant 0 : index
    %c0_1 = arith.constant 0 : index
    %3 = vector.load %arg4[%c0, %c0_1] : memref<8x384xf32, #tpu.memory_space<vmem>>, vector<8x384xf32>
    %c0_2 = arith.constant 0 : index
    %c0_3 = arith.constant 0 : index
    %4 = vector.load %arg1[%c0_2, %c0_3] : memref<8x2048xf32, #tpu.memory_space<vmem>>, vector<8x2048xf32>
    %5 = arith.truncf %4 : vector<8x2048xf32> to vector<8x2048xbf16>
    %c0_4 = arith.constant 0 : index
    %c0_5 = arith.constant 0 : index
    %6 = vector.load %arg2[%c0_4, %c0_5] : memref<2048x384xbf16, #tpu.memory_space<vmem>>, vector<2048x384xbf16>
    %cst = arith.constant dense<0.000000e+00> : vector<8x384xf32>
    %7 = tpu.matmul %5, %6, %cst {dimension_numbers = #tpu.dot_dimension_numbers<[1], [0], [0], [1], [0, 0, 1, 1], [], []>} : vector<8x2048xbf16>, vector<2048x384xbf16>, vector<8x384xf32> -> vector<8x384xf32>
    %8 = arith.addf %3, %7 : vector<8x384xf32>
    %c0_6 = arith.constant 0 : index
    %c0_7 = arith.constant 0 : index
    %9 = vector.load %arg4[%c0_6, %c0_7] : memref<8x384xf32, #tpu.memory_space<vmem>>, vector<8x384xf32>
    tpu.vector_store %arg4[%c0_6, %c0_7], %8 {strides = array<i32>} : memref<8x384xf32, #tpu.memory_space<vmem>>, vector<8x384xf32>,
    return
  }
  func.func @transform_0(%arg0: i32) -> (i32, i32) {
    %c0_i32 = arith.constant 0 : i32
    %c0_i32_0 = arith.constant 0 : i32
    return %c0_i32, %arg0 : i32, i32
  }
  func.func @transform_1(%arg0: i32) -> (i32, i32) {
    %c0_i32 = arith.constant 0 : i32
    %c0_i32_0 = arith.constant 0 : i32
    return %arg0, %c0_i32 : i32, i32
  }
  func.func @transform_2(%arg0: i32) -> (i32, i32) {
    %c0_i32 = arith.constant 0 : i32
    %c0_i32_0 = arith.constant 0 : i32
    %c0_i32_1 = arith.constant 0 : i32
    return %c0_i32, %c0_i32_0 : i32, i32
  }
  func.func @transform_3(%arg0: i32) -> (i32, i32) {
    %c0_i32 = arith.constant 0 : i32
    %c0_i32_0 = arith.constant 0 : i32
    %c0_i32_1 = arith.constant 0 : i32
    return %c0_i32, %c0_i32_0 : i32, i32
  }
}

</mosaic_0001>

<bundles_post_ra>
// kernel: tpu_custom_call.1
= control target key start
LH: loop header
LB: loop body
LE: loop exit
PB: predicated region body
PF: predicated region fallthrough
CT: control target
= control target key end

     0   :  { %8 = vsyncpa [#allocation3], 0  ;;  %s5517_s0 = inlined_call_operand.hbm [shape: f32[8,2048], index: 0, kind: input, shape index: {}]   ;;  %s5518_s1 = inlined_call_operand.hbm [shape: bf16[2048,384], index: 1, kind: input, shape index: {}]   ;;  %s5519_s2 = inlined_call_operand.hbm [shape: f32[1,384], index: 2, kind: input, shape index: {}]   ;;  %s5520_s3 = inlined_call_operand.hbm [shape: f32[8,384], index: 3, kind: output, shape index: {}]  }
   0x1   :  { %9 = vsyncpa [#allocation6], 0  ;;  %s26_s14 = sshll.u32 %s5518_s1, 4  ;;  %s27_s14 = int_to_ptr.hbm [resolvable:$true] %s26_s14 }
   0x2   :  { %10 = vsyncpa [#allocation4], 0  ;;  %s5345_s15 = smov [#allocation5]   ;;  %s16_s19 = sshll.u32 %s5517_s0, 4  ;;  %s17_s19 = int_to_ptr.hbm [resolvable:$true] %s16_s19 }
   0x3   :  { %s28_s16 = sshll.u32 %s5345_s15, 4  ;;  %s5346_s20 = smov 192   ;;  %s29_s16 = int_to_ptr.vmem [resolvable:$true] %s28_s16 }
   0x4   :  { %s5347_s21 = smov 12   ;;  %s5348_s22 = smov [#allocation2]  }
   0x5   :  { %34 = dma.hbm_to_vmem [thread:$0]  %s27_s14, 49152, %s29_s16, [#allocation6], %s5346_s20, %s5346_s20, %s5347_s21  }
   0x6   :  { %s18_s23 = sshll.u32 %s5348_s22, 4  ;;  %s40_s26 = sshll.u32 %s5519_s2, 4  ;;  %s19_s23 = int_to_ptr.vmem [resolvable:$true] %s18_s23  ;;  %s41_s26 = int_to_ptr.hbm [resolvable:$true] %s40_s26 }
   0x7   :  { %21 = dma.hbm_to_vmem [thread:$0]  %s17_s19, 2048, %s19_s23, [#allocation3]  }
   0x8   :  { %s5349_s1 = smov [#allocation7]  }
   0x9   :  { %s42_s27 = sshll.u32 %s5349_s1, 4  ;;  %s43_s27 = int_to_ptr.vmem [resolvable:$true] %s42_s27 }
   0xa   :  { %45 = dma.hbm_to_vmem [thread:$0]  %s41_s26, 48, %s43_s27, [#allocation6]  }
   0xb   :  { %5339 = dma.done.wait [#allocation3], 2048  }
   0xc   :  { %5340 = vsyncadd [#allocation3], 4294965248 }
   0xd   :  { %5341 = dma.done.wait [#allocation6], 49200  }
   0xe   :  { %5342 = vsyncadd [#allocation6], 4294918096  ;;  %v3402_v0 = vld [vmem:[#allocation5 + $0xa8] sm:$0xf]  ;;  %v4874_v1 = vld [vmem:[#allocation5 + $0xb0] sm:$0xf0] }
   0xf   :  { %v3498_v2 = vld [vmem:[#allocation5 + $0x168] sm:$0xf]  ;;  %v3403_v3 = vor.u32 %v4874_v1, %v3402_v0  ;;  %v4898_v4 = vld [vmem:[#allocation5 + $0x170] sm:$0xf0]  ;;  %v3390_v11 = vld [vmem:[#allocation5 + $0x90] sm:$0xf] }
  0x10   :  { %v3594_v5 = vld [vmem:[#allocation5 + $0x228] sm:$0xf]  ;;  %v4922_v6 = vld [vmem:[#allocation5 + $0x230] sm:$0xf0]  ;;  %v3499_v7 = vor.u32 %v4898_v4, %v3498_v2  ;;  %v4871_v13 = vld [vmem:[#allocation5 + $0x98] sm:$0xf0] }
  0x11   :  { %v3595_v8 = vor.u32 %v4922_v6, %v3594_v5  ;;  %v3690_v9 = vld [vmem:[#allocation5 + $0x2e8] sm:$0xf]  ;;  %v4946_v10 = vld [vmem:[#allocation5 + $0x2f0] sm:$0xf0]  ;;  %2668 = vmatpush.bf16.msra.mxu0 %v3403_v3  ;;  %v3486_v14 = vld [vmem:[#allocation5 + $0x150] sm:$0xf]  ;;  %v3391_v16 = vor.u32 %v4871_v13, %v3390_v11 }
  0x12   :  { %v3691_v12 = vor.u32 %v4946_v10, %v3690_v9  ;;  %v4895_v15 = vld [vmem:[#allocation5 + $0x158] sm:$0xf0]  ;;  %2681 = vmatpush.bf16.msra.mxu1 %v3499_v7  ;;  %v3582_v18 = vld [vmem:[#allocation5 + $0x210] sm:$0xf]  ;;  %v3378_v23 = vld [vmem:[#allocation5 + $0x78] sm:$0xf] }
  0x13   :  { %2694 = vmatpush.bf16.msra.mxu2 %v3595_v8  ;;  %v3487_v17 = vor.u32 %v4895_v15, %v3486_v14  ;;  %v4919_v19 = vld [vmem:[#allocation5 + $0x218] sm:$0xf0]  ;;  %v3678_v20 = vld [vmem:[#allocation5 + $0x2d0] sm:$0xf]  ;;  %v4868_v24 = vld [vmem:[#allocation5 + $0x80] sm:$0xf0] }
  0x14   :  { %2707 = vmatpush.bf16.msra.mxu3 %v3691_v12  ;;  %v3583_v21 = vor.u32 %v4919_v19, %v3582_v18  ;;  %v4943_v22 = vld [vmem:[#allocation5 + $0x2d8] sm:$0xf0]  ;;  %v3474_v26 = vld [vmem:[#allocation5 + $0x138] sm:$0xf]  ;;  %v4892_v27 = vld [vmem:[#allocation5 + $0x140] sm:$0xf0]  ;;  %v3379_v29 = vor.u32 %v4868_v24, %v3378_v23 }
  0x15   :  { %v3679_v25 = vor.u32 %v4943_v22, %v3678_v20  ;;  %v3570_v28 = vld [vmem:[#allocation5 + $0x1f8] sm:$0xf]  ;;  %2669 = vmatpush.bf16.msra.mxu0 %v3391_v16  ;;  %v4916_v30 = vld [vmem:[#allocation5 + $0x200] sm:$0xf0]  ;;  %v3475_v33 = vor.u32 %v4892_v27, %v3474_v26  ;;  %v3366_v35 = vld [vmem:[#allocation5 + $0x60] sm:$0xf] }
  0x16   :  { %v3666_v31 = vld [vmem:[#allocation5 + $0x2b8] sm:$0xf]  ;;  %v4940_v32 = vld [vmem:[#allocation5 + $0x2c0] sm:$0xf0]  ;;  %2682 = vmatpush.bf16.msra.mxu1 %v3487_v17  ;;  %v3571_v34 = vor.u32 %v4916_v30, %v3570_v28  ;;  %v4865_v36 = vld [vmem:[#allocation5 + $0x68] sm:$0xf0] }
  0x17   :  { %2695 = vmatpush.bf16.msra.mxu2 %v3583_v21  ;;  %v3462_v37 = vld [vmem:[#allocation5 + $0x120] sm:$0xf]  ;;  %v3667_v38 = vor.u32 %v4940_v32, %v3666_v31  ;;  %v4889_v39 = vld [vmem:[#allocation5 + $0x128] sm:$0xf0]  ;;  %v3367_v44 = vor.u32 %v4865_v36, %v3366_v35  ;;  %v3354_v47 = vld [vmem:[#allocation5 + $0x48] sm:$0xf] }
  0x18   :  { %2708 = vmatpush.bf16.msra.mxu3 %v3679_v25  ;;  %v3558_v40 = vld [vmem:[#allocation5 + $0x1e0] sm:$0xf]  ;;  %v4913_v41 = vld [vmem:[#allocation5 + $0x1e8] sm:$0xf0]  ;;  %v3463_v45 = vor.u32 %v4889_v39, %v3462_v37  ;;  %v4862_v48 = vld [vmem:[#allocation5 + $0x50] sm:$0xf0] }
  0x19   :  { %v3654_v42 = vld [vmem:[#allocation5 + $0x2a0] sm:$0xf]  ;;  %v4937_v43 = vld [vmem:[#allocation5 + $0x2a8] sm:$0xf0]  ;;  %2670 = vmatpush.bf16.msra.mxu0 %v3379_v29  ;;  %v3559_v46 = vor.u32 %v4913_v41, %v3558_v40  ;;  %v3450_v49 = vld [vmem:[#allocation5 + $0x108] sm:$0xf]  ;;  %v3355_v56 = vor.u32 %v4862_v48, %v3354_v47 }
  0x1a   :  { %2683 = vmatpush.bf16.msra.mxu1 %v3475_v33  ;;  %v3655_v50 = vor.u32 %v4937_v43, %v3654_v42  ;;  %v4886_v51 = vld [vmem:[#allocation5 + $0x110] sm:$0xf0]  ;;  %v3546_v52 = vld [vmem:[#allocation5 + $0x1c8] sm:$0xf]  ;;  %v3342_v59 = vld [vmem:[#allocation5 + $0x30] sm:$0xf] }
  0x1b   :  { %2696 = vmatpush.bf16.msra.mxu2 %v3571_v34  ;;  %v4910_v53 = vld [vmem:[#allocation5 + $0x1d0] sm:$0xf0]  ;;  %v3642_v54 = vld [vmem:[#allocation5 + $0x288] sm:$0xf]  ;;  %v3451_v57 = vor.u32 %v4886_v51, %v3450_v49  ;;  %v4859_v60 = vld [vmem:[#allocation5 + $0x38] sm:$0xf0] }
  0x1c   :  { %2709 = vmatpush.bf16.msra.mxu3 %v3667_v38  ;;  %v4934_v55 = vld [vmem:[#allocation5 + $0x290] sm:$0xf0]  ;;  %v3547_v58 = vor.u32 %v4910_v53, %v3546_v52  ;;  %v3438_v61 = vld [vmem:[#allocation5 + $0xf0] sm:$0xf]  ;;  %v4883_v63 = vld [vmem:[#allocation5 + $0xf8] sm:$0xf0]  ;;  %v3343_v4 = vor.u32 %v4859_v60, %v3342_v59 }
  0x1d   :  { %2671 = vmatpush.bf16.msra.mxu0 %v3367_v44  ;;  %v3643_v62 = vor.u32 %v4934_v55, %v3642_v54  ;;  %v3534_v0 = vld [vmem:[#allocation5 + $0x1b0] sm:$0xf]  ;;  %v4907_v1 = vld [vmem:[#allocation5 + $0x1b8] sm:$0xf0]  ;;  %v3439_v5 = vor.u32 %v4883_v63, %v3438_v61  ;;  %v3330_v7 = vld [vmem:[#allocation5 + $0x18] sm:$0xf] }
  0x1e   :  { %2684 = vmatpush.bf16.msra.mxu1 %v3463_v45  ;;  %v3630_v2 = vld [vmem:[#allocation5 + $0x270] sm:$0xf]  ;;  %v4931_v3 = vld [vmem:[#allocation5 + $0x278] sm:$0xf0]  ;;  %v3535_v6 = vor.u32 %v4907_v1, %v3534_v0  ;;  %v4856_v8 = vld [vmem:[#allocation5 + $0x20] sm:$0xf0] }
  0x1f   :  { %2697 = vmatpush.bf16.msra.mxu2 %v3559_v46  ;;  %v3426_v9 = vld [vmem:[#allocation5 + $0xd8] sm:$0xf]  ;;  %v3631_v10 = vor.u32 %v4931_v3, %v3630_v2  ;;  %v4880_v11 = vld [vmem:[#allocation5 + $0xe0] sm:$0xf0]  ;;  %v3331_v16 = vor.u32 %v4856_v8, %v3330_v7  ;;  %v3318_v17 = vld [vmem:[#allocation5] sm:$0xf] }
  0x20   :  { %2710 = vmatpush.bf16.msra.mxu3 %v3655_v50  ;;  %v3522_v12 = vld [vmem:[#allocation5 + $0x198] sm:$0xf]  ;;  %v4904_v13 = vld [vmem:[#allocation5 + $0x1a0] sm:$0xf0]  ;;  %v4853_v18 = vld [vmem:[#allocation5 + $0x8] sm:$0xf0]  ;;  %v3427_v19 = vor.u32 %v4880_v11, %v3426_v9 }
  0x21   :  { %2672 = vmatpush.bf16.msra.mxu0 %v3355_v56  ;;  %v3618_v14 = vld [vmem:[#allocation5 + $0x258] sm:$0xf]  ;;  %v4928_v15 = vld [vmem:[#allocation5 + $0x260] sm:$0xf0]  ;;  %v3523_v20 = vor.u32 %v4904_v13, %v3522_v12  ;;  %v3414_v21 = vld [vmem:[#allocation5 + $0xc0] sm:$0xf]  ;;  %v3319_v31 = vor.u32 %v4853_v18, %v3318_v17 }
  0x22   :  { %2685 = vmatpush.bf16.msra.mxu1 %v3451_v57  ;;  %v4877_v22 = vld [vmem:[#allocation5 + $0xc8] sm:$0xf0]  ;;  %v3510_v23 = vld [vmem:[#allocation5 + $0x180] sm:$0xf]  ;;  %v3619_v24 = vor.u32 %v4928_v15, %v3618_v14  ;;  %v3786_v28 = vld [vmem:[#allocation5 + $0x3a8] sm:$0xf] }
  0x23   :  { %2698 = vmatpush.bf16.msra.mxu2 %v3547_v58  ;;  %v4901_v25 = vld [vmem:[#allocation5 + $0x188] sm:$0xf0]  ;;  %v3606_v26 = vld [vmem:[#allocation5 + $0x240] sm:$0xf]  ;;  %v4970_v29 = vld [vmem:[#allocation5 + $0x3b0] sm:$0xf0]  ;;  %v3415_v35 = vor.u32 %v4877_v22, %v3414_v21 }
  0x24   :  { %2711 = vmatpush.bf16.msra.mxu3 %v3643_v62  ;;  %v4925_v27 = vld [vmem:[#allocation5 + $0x248] sm:$0xf0]  ;;  %v3882_v30 = vld [vmem:[#allocation5 + $0x468] sm:$0xf]  ;;  %v4994_v32 = vld [vmem:[#allocation5 + $0x470] sm:$0xf0]  ;;  %v3511_v36 = vor.u32 %v4901_v25, %v3510_v23  ;;  %v3787_v40 = vor.u32 %v4970_v29, %v3786_v28 }
  0x25   :  { %2673 = vmatpush.bf16.msra.mxu0 %v3343_v4  ;;  %v3978_v33 = vld [vmem:[#allocation5 + $0x528] sm:$0xf]  ;;  %v5018_v34 = vld [vmem:[#allocation5 + $0x530] sm:$0xf0]  ;;  %v3607_v39 = vor.u32 %v4925_v27, %v3606_v26  ;;  %v3883_v41 = vor.u32 %v4994_v32, %v3882_v30  ;;  %v3774_v43 = vld [vmem:[#allocation5 + $0x390] sm:$0xf] }
  0x26   :  { %2686 = vmatpush.bf16.msra.mxu1 %v3439_v5  ;;  %v4074_v37 = vld [vmem:[#allocation5 + $0x5e8] sm:$0xf]  ;;  %v5042_v38 = vld [vmem:[#allocation5 + $0x5f0] sm:$0xf0]  ;;  %v3979_v42 = vor.u32 %v5018_v34, %v3978_v33  ;;  %v4967_v44 = vld [vmem:[#allocation5 + $0x398] sm:$0xf0] }
  0x27   :  { %2699 = vmatpush.bf16.msra.mxu2 %v3535_v6  ;;  %v3870_v45 = vld [vmem:[#allocation5 + $0x450] sm:$0xf]  ;;  %v4075_v46 = vor.u32 %v5042_v38, %v4074_v37  ;;  %v4991_v47 = vld [vmem:[#allocation5 + $0x458] sm:$0xf0]  ;;  %v3775_v52 = vor.u32 %v4967_v44, %v3774_v43  ;;  %v3762_v53 = vld [vmem:[#allocation5 + $0x378] sm:$0xf] }
  0x28   :  { %2712 = vmatpush.bf16.msra.mxu3 %v3631_v10  ;;  %v3966_v48 = vld [vmem:[#allocation5 + $0x510] sm:$0xf]  ;;  %v5015_v49 = vld [vmem:[#allocation5 + $0x518] sm:$0xf0]  ;;  %v3871_v54 = vor.u32 %v4991_v47, %v3870_v45  ;;  %v4964_v56 = vld [vmem:[#allocation5 + $0x380] sm:$0xf0] }
  0x29   :  { %2674 = vmatpush.bf16.msra.mxu0 %v3331_v16  ;;  %v4062_v50 = vld [vmem:[#allocation5 + $0x5d0] sm:$0xf]  ;;  %v5039_v51 = vld [vmem:[#allocation5 + $0x5d8] sm:$0xf0]  ;;  %v3967_v55 = vor.u32 %v5015_v49, %v3966_v48  ;;  %v3858_v57 = vld [vmem:[#allocation5 + $0x438] sm:$0xf]  ;;  %v3763_v2 = vor.u32 %v4964_v56, %v3762_v53 }
  0x2a   :  { %2687 = vmatpush.bf16.msra.mxu1 %v3427_v19  ;;  %v78_v58 = vld [vmem:[#allocation2 + $0x10] sm:$0xff]  ;;  %v4063_v59 = vor.u32 %v5039_v51, %v4062_v50  ;;  %v4988_v60 = vld [vmem:[#allocation5 + $0x440] sm:$0xf0]  ;;  %v3954_v61 = vld [vmem:[#allocation5 + $0x4f8] sm:$0xf]  ;;  %s5350_s0 = smov [#allocation8]  }
  0x2b   :  { %2700 = vmatpush.bf16.msra.mxu2 %v3523_v20  ;;  %v5012_v62 = vld [vmem:[#allocation5 + $0x500] sm:$0xf0]  ;;  %v5380_v63 = vpack.c.bf16 %v78_v58, %v78_v58  ;;  %v4050_v0 = vld [vmem:[#allocation5 + $0x5b8] sm:$0xf]  ;;  %v3750_v3 = vld [vmem:[#allocation5 + $0x360] sm:$0xf]  ;;  %v3859_v6 = vor.u32 %v4988_v60, %v3858_v57 }
  0x2c   :  { %2713 = vmatpush.bf16.msra.mxu3 %v3619_v24  ;;  %v5036_v1 = vld [vmem:[#allocation5 + $0x5c0] sm:$0xf0]  ;;  %v4961_v4 = vld [vmem:[#allocation5 + $0x368] sm:$0xf0]  ;;  %v3955_v7 = vor.u32 %v5012_v62, %v3954_v61  ;;  %v3846_v8 = vld [vmem:[#allocation5 + $0x420] sm:$0xf] }
  0x2d   :  { %2675 = vmatpush.bf16.msra.mxu0 %v3319_v31  ;;  %v76_v5 = vld [vmem:[#allocation2] sm:$0xff]  ;;  %v79_v10 = vld [vmem:[#allocation2 + $0x18] sm:$0xff]  ;;  %v77_v11 = vld [vmem:[#allocation2 + $0x8] sm:$0xff]  ;;  %v4051_v12 = vor.u32 %v5036_v1, %v4050_v0  ;;  %v3751_v20 = vor.u32 %v4961_v4, %v3750_v3  ;;  %s3303_s2 = sshll.u32 %s5350_s0, 4  ;;  %s3305_s30 = sshll.u32 %s5520_s3, 4  ;;  %s3304_s2 = int_to_ptr.vmem [resolvable:$true] %s3303_s2  ;;  %s3306_s30 = int_to_ptr.hbm [resolvable:$true] %s3305_s30 }
  0x2e   :  { %2688 = vmatpush.bf16.msra.mxu1 %v3415_v35  ;;  %v5383_v9 = vpack.c.bf16 %v76_v5, %v76_v5  ;;  %v4985_v13 = vld [vmem:[#allocation5 + $0x428] sm:$0xf0]  ;;  %v3942_v14 = vld [vmem:[#allocation5 + $0x4e0] sm:$0xf]  ;;  %v5385_v16 = vpack.c.bf16 %v79_v10, %v79_v10  ;;  %v5387_v17 = vpack.c.bf16 %v77_v11, %v77_v11  ;;  %v3738_v23 = vld [vmem:[#allocation5 + $0x348] sm:$0xf] }
  0x2f   :  { %2701 = vmatpush.bf16.msra.mxu2 %v3511_v36  ;;  %v5009_v15 = vld [vmem:[#allocation5 + $0x4e8] sm:$0xf0]  ;;  %v4038_v18 = vld [vmem:[#allocation5 + $0x5a0] sm:$0xf]  ;;  %v3847_v21 = vor.u32 %v4985_v13, %v3846_v8  ;;  %v4958_v24 = vld [vmem:[#allocation5 + $0x350] sm:$0xf0] }
  0x30   :  { %2714 = vmatpush.bf16.msra.mxu3 %v3607_v39  ;;  %v5033_v19 = vld [vmem:[#allocation5 + $0x5a8] sm:$0xf0]  ;;  %2676 = vmatmul.bf16.vlgmr.msra.gmra.mxu0 %v5383_v9  ;;  %v3943_v22 = vor.u32 %v5009_v15, %v3942_v14  ;;  %v3834_v25 = vld [vmem:[#allocation5 + $0x408] sm:$0xf]  ;;  %v4982_v27 = vld [vmem:[#allocation5 + $0x410] sm:$0xf0]  ;;  %v3739_v32 = vor.u32 %v4958_v24, %v3738_v23 }
  0x31   :  { %2720 = vmatpush.bf16.msrb.mxu0 %v3787_v40  ;;  %v4039_v26 = vor.u32 %v5033_v19, %v4038_v18  ;;  %v3930_v28 = vld [vmem:[#allocation5 + $0x4c8] sm:$0xf]  ;;  %v5006_v29 = vld [vmem:[#allocation5 + $0x4d0] sm:$0xf0]  ;;  %2689 = vmatmul.bf16.vlgmr.msra.gmra.mxu1 %v5387_v17  ;;  %v3835_v33 = vor.u32 %v4982_v27, %v3834_v25  ;;  %v3726_v35 = vld [vmem:[#allocation5 + $0x330] sm:$0xf] }
  0x32   :  { %2733 = vmatpush.bf16.msrb.mxu1 %v3883_v41  ;;  %2702 = vmatmul.bf16.vlgmr.msra.gmra.mxu2 %v5380_v63  ;;  %v4026_v30 = vld [vmem:[#allocation5 + $0x588] sm:$0xf]  ;;  %v5030_v31 = vld [vmem:[#allocation5 + $0x590] sm:$0xf0]  ;;  %v3931_v34 = vor.u32 %v5006_v29, %v3930_v28  ;;  %v4955_v36 = vld [vmem:[#allocation5 + $0x338] sm:$0xf0] }
  0x33   :  { %2746 = vmatpush.bf16.msrb.mxu2 %v3979_v42  ;;  %2715 = vmatmul.bf16.vlgmr.msra.gmra.mxu3 %v5385_v16  ;;  %v3822_v37 = vld [vmem:[#allocation5 + $0x3f0] sm:$0xf]  ;;  %v4027_v38 = vor.u32 %v5030_v31, %v4026_v30  ;;  %v4979_v39 = vld [vmem:[#allocation5 + $0x3f8] sm:$0xf0]  ;;  %v3727_v44 = vor.u32 %v4955_v36, %v3726_v35  ;;  %v3714_v47 = vld [vmem:[#allocation5 + $0x318] sm:$0xf] }
  0x34   :  { %2759 = vmatpush.bf16.msrb.mxu3 %v4075_v46  ;;  %v3918_v40 = vld [vmem:[#allocation5 + $0x4b0] sm:$0xf]  ;;  %v5003_v41 = vld [vmem:[#allocation5 + $0x4b8] sm:$0xf0]  ;;  %v3823_v45 = vor.u32 %v4979_v39, %v3822_v37  ;;  %v4952_v48 = vld [vmem:[#allocation5 + $0x320] sm:$0xf0] }
  0x35   :  { %2721 = vmatpush.bf16.msrb.mxu0 %v3775_v52  ;;  %v4014_v42 = vld [vmem:[#allocation5 + $0x570] sm:$0xf]  ;;  %v5027_v43 = vld [vmem:[#allocation5 + $0x578] sm:$0xf0]  ;;  %v3919_v46 = vor.u32 %v5003_v41, %v3918_v40  ;;  %v3810_v49 = vld [vmem:[#allocation5 + $0x3d8] sm:$0xf]  ;;  %v3715_v56 = vor.u32 %v4952_v48, %v3714_v47 }
  0x36   :  { %2734 = vmatpush.bf16.msrb.mxu1 %v3871_v54  ;;  %v4015_v50 = vor.u32 %v5027_v43, %v4014_v42  ;;  %v4976_v51 = vld [vmem:[#allocation5 + $0x3e0] sm:$0xf0]  ;;  %v3906_v52 = vld [vmem:[#allocation5 + $0x498] sm:$0xf]  ;;  %v3702_v57 = vld [vmem:[#allocation5 + $0x300] sm:$0xf] }
  0x37   :  { %2747 = vmatpush.bf16.msrb.mxu2 %v3967_v55  ;;  %v5000_v53 = vld [vmem:[#allocation5 + $0x4a0] sm:$0xf0]  ;;  %v4002_v54 = vld [vmem:[#allocation5 + $0x558] sm:$0xf]  ;;  %v4949_v58 = vld [vmem:[#allocation5 + $0x308] sm:$0xf0] }
  0x38   :  { %2760 = vmatpush.bf16.msrb.mxu3 %v4063_v59  ;;  %v5024_v55 = vld [vmem:[#allocation5 + $0x560] sm:$0xf0]  ;;  %v3811_v59 = vor.u32 %v4976_v51, %v3810_v49  ;;  %v3907_v60 = vor.u32 %v5000_v53, %v3906_v52  ;;  %v3798_v61 = vld [vmem:[#allocation5 + $0x3c0] sm:$0xf]  ;;  %v4973_v62 = vld [vmem:[#allocation5 + $0x3c8] sm:$0xf0]  ;;  %v3703_v8 = vor.u32 %v4949_v58, %v3702_v57 }
  0x39   :  { %2722 = vmatpush.bf16.msrb.mxu0 %v3763_v2  ;;  %v3894_v0 = vld [vmem:[#allocation5 + $0x480] sm:$0xf]  ;;  %v4003_v1 = vor.u32 %v5024_v55, %v4002_v54  ;;  %v4997_v2 = vld [vmem:[#allocation5 + $0x488] sm:$0xf0]  ;;  %v4170_v5 = vld [vmem:[#allocation5 + $0x6a8] sm:$0xf]  ;;  %v3799_v13 = vor.u32 %v4973_v62, %v3798_v61 }
  0x3a   :  { %2735 = vmatpush.bf16.msrb.mxu1 %v3859_v6  ;;  %v3990_v3 = vld [vmem:[#allocation5 + $0x540] sm:$0xf]  ;;  %v5021_v4 = vld [vmem:[#allocation5 + $0x548] sm:$0xf0]  ;;  %v5066_v6 = vld [vmem:[#allocation5 + $0x6b0] sm:$0xf0]  ;;  %v3895_v14 = vor.u32 %v4997_v2, %v3894_v0 }
  0x3b   :  { %2748 = vmatpush.bf16.msrb.mxu2 %v3955_v7  ;;  %v4266_v7 = vld [vmem:[#allocation5 + $0x768] sm:$0xf]  ;;  %v5090_v10 = vld [vmem:[#allocation5 + $0x770] sm:$0xf0]  ;;  %v80_v23 = vld [vmem:[#allocation2 + $0x20] sm:$0xff] }
  0x3c   :  { %2761 = vmatpush.bf16.msrb.mxu3 %v4051_v12  ;;  %v4362_v11 = vld [vmem:[#allocation5 + $0x828] sm:$0xf]  ;;  %v5114_v12 = vld [vmem:[#allocation5 + $0x830] sm:$0xf0]  ;;  %v83_v24 = vld [vmem:[#allocation2 + $0x38] sm:$0xff]  ;;  %v4267_v25 = vor.u32 %v5090_v10, %v4266_v7  ;;  %v5394_v37 = vpack.c.bf16 %v80_v23, %v80_v23 }
  0x3d   :  { %2723 = vmatpush.bf16.msrb.mxu0 %v3751_v20  ;;  %v4458_v15 = vld [vmem:[#allocation5 + $0x8e8] sm:$0xf]  ;;  %v5138_v18 = vld [vmem:[#allocation5 + $0x8f0] sm:$0xf0]  ;;  %v3991_v20 = vor.u32 %v5021_v4, %v3990_v3  ;;  %v5063_v27 = vld [vmem:[#allocation5 + $0x698] sm:$0xf0] }
  0x3e   :  { %2736 = vmatpush.bf16.msrb.mxu1 %v3847_v21  ;;  %v82_v19 = vld [vmem:[#allocation2 + $0x30] sm:$0xff]  ;;  %v4171_v21 = vor.u32 %v5066_v6, %v4170_v5  ;;  %v81_v29 = vld [vmem:[#allocation2 + $0x28] sm:$0xff]  ;;  %v4459_v30 = vor.u32 %v5138_v18, %v4458_v15  ;;  %v5087_v31 = vld [vmem:[#allocation5 + $0x758] sm:$0xf0] }
  0x3f   :  { %2749 = vmatpush.bf16.msrb.mxu2 %v3943_v22  ;;  %v4158_v22 = vld [vmem:[#allocation5 + $0x690] sm:$0xf]  ;;  %v5135_v36 = vld [vmem:[#allocation5 + $0x8d8] sm:$0xf0]  ;;  %v5398_v40 = vpack.c.bf16 %v81_v29, %v81_v29  ;;  %v4146_v43 = vld [vmem:[#allocation5 + $0x678] sm:$0xf] }
  0x40   :  { %2762 = vmatpush.bf16.msrb.mxu3 %v4039_v26  ;;  %v4363_v26 = vor.u32 %v5114_v12, %v4362_v11  ;;  %v4254_v28 = vld [vmem:[#allocation5 + $0x750] sm:$0xf]  ;;  %v4159_v39 = vor.u32 %v5063_v27, %v4158_v22  ;;  %v5084_v47 = vld [vmem:[#allocation5 + $0x740] sm:$0xf0]  ;;  %v4338_v48 = vld [vmem:[#allocation5 + $0x7f8] sm:$0xf] }
  0x41   :  { %2724 = vmatpush.bf16.msrb.mxu0 %v3739_v32  ;;  %v4350_v32 = vld [vmem:[#allocation5 + $0x810] sm:$0xf]  ;;  %v4255_v41 = vor.u32 %v5087_v31, %v4254_v28  ;;  %v5108_v49 = vld [vmem:[#allocation5 + $0x800] sm:$0xf0]  ;;  %v4134_v55 = vld [vmem:[#allocation5 + $0x660] sm:$0xf] }
  0x42   :  { %2737 = vmatpush.bf16.msrb.mxu1 %v3835_v33  ;;  %v5111_v33 = vld [vmem:[#allocation5 + $0x818] sm:$0xf0]  ;;  %v4446_v35 = vld [vmem:[#allocation5 + $0x8d0] sm:$0xf]  ;;  %v5132_v51 = vld [vmem:[#allocation5 + $0x8c0] sm:$0xf0]  ;;  %v4339_v54 = vor.u32 %v5108_v49, %v4338_v48 }
  0x43   :  { %2750 = vmatpush.bf16.msrb.mxu2 %v3931_v34  ;;  %v5392_v34 = vpack.c.bf16 %v82_v19, %v82_v19  ;;  %v4351_v42 = vor.u32 %v5111_v33, %v4350_v32  ;;  %v4230_v57 = vld [vmem:[#allocation5 + $0x720] sm:$0xf]  ;;  %v5105_v61 = vld [vmem:[#allocation5 + $0x7e8] sm:$0xf0]  ;;  %v4122_v4 = vld [vmem:[#allocation5 + $0x648] sm:$0xf] }
  0x44   :  { %2763 = vmatpush.bf16.msrb.mxu3 %v4027_v38  ;;  %v5396_v38 = vpack.c.bf16 %v83_v24, %v83_v24  ;;  %v4422_v62 = vld [vmem:[#allocation5 + $0x8a0] sm:$0xf]  ;;  %v5129_v0 = vld [vmem:[#allocation5 + $0x8a8] sm:$0xf0]  ;;  %v5054_v5 = vld [vmem:[#allocation5 + $0x650] sm:$0xf0] }
  0x45   :  { %2725 = vmatpush.bf16.msrb.mxu0 %v3727_v44  ;;  %v5060_v44 = vld [vmem:[#allocation5 + $0x680] sm:$0xf0]  ;;  %v4218_v6 = vld [vmem:[#allocation5 + $0x708] sm:$0xf]  ;;  %v4423_v7 = vor.u32 %v5129_v0, %v4422_v62  ;;  %v5102_v11 = vld [vmem:[#allocation5 + $0x7d0] sm:$0xf0] }
  0x46   :  { %2738 = vmatpush.bf16.msrb.mxu1 %v3823_v45  ;;  %v4242_v45 = vld [vmem:[#allocation5 + $0x738] sm:$0xf]  ;;  %v4147_v52 = vor.u32 %v5060_v44, %v4146_v43  ;;  %v4314_v10 = vld [vmem:[#allocation5 + $0x7c8] sm:$0xf]  ;;  %v4110_v19 = vld [vmem:[#allocation5 + $0x630] sm:$0xf] }
  0x47   :  { %2751 = vmatpush.bf16.msrb.mxu2 %v3919_v46  ;;  %v4447_v46 = vor.u32 %v5135_v36, %v4446_v35  ;;  %v4243_v53 = vor.u32 %v5084_v47, %v4242_v45  ;;  %v4410_v12 = vld [vmem:[#allocation5 + $0x888] sm:$0xf]  ;;  %v4315_v18 = vor.u32 %v5102_v11, %v4314_v10  ;;  %v5075_v23 = vld [vmem:[#allocation5 + $0x6f8] sm:$0xf0]  ;;  %v4302_v24 = vld [vmem:[#allocation5 + $0x7b0] sm:$0xf] }
  0x48   :  { %2764 = vmatpush.bf16.msrb.mxu3 %v4015_v50  ;;  %v4434_v50 = vld [vmem:[#allocation5 + $0x8b8] sm:$0xf]  ;;  %v5123_v27 = vld [vmem:[#allocation5 + $0x878] sm:$0xf0]  ;;  %v5048_v32 = vld [vmem:[#allocation5 + $0x620] sm:$0xf0] }
  0x49   :  { %2726 = vmatpush.bf16.msrb.mxu0 %v3715_v56  ;;  %v5057_v56 = vld [vmem:[#allocation5 + $0x668] sm:$0xf0]  ;;  %v4435_v58 = vor.u32 %v5132_v51, %v4434_v50  ;;  %v4098_v31 = vld [vmem:[#allocation5 + $0x618] sm:$0xf]  ;;  %v5072_v36 = vld [vmem:[#allocation5 + $0x6e0] sm:$0xf0] }
  0x4a   :  { %2739 = vmatpush.bf16.msrb.mxu1 %v3811_v59  ;;  %v5081_v59 = vld [vmem:[#allocation5 + $0x728] sm:$0xf0]  ;;  %v4194_v33 = vld [vmem:[#allocation5 + $0x6d8] sm:$0xf]  ;;  %v5120_v43 = vld [vmem:[#allocation5 + $0x860] sm:$0xf0]  ;;  %v4099_v44 = vor.u32 %v5048_v32, %v4098_v31 }
  0x4b   :  { %2752 = vmatpush.bf16.msrb.mxu2 %v3907_v60  ;;  %v4326_v60 = vld [vmem:[#allocation5 + $0x7e0] sm:$0xf]  ;;  %v4231_v2 = vor.u32 %v5081_v59, %v4230_v57  ;;  %v4195_v47 = vor.u32 %v5072_v36, %v4194_v33  ;;  %v5069_v50 = vld [vmem:[#allocation5 + $0x6c8] sm:$0xf0]  ;;  %v5162_v57 = vld [vmem:[#allocation5 + $0x9b0] sm:$0xf0] }
  0x4c   :  { %2765 = vmatpush.bf16.msrb.mxu3 %v4003_v1  ;;  %v4135_v1 = vor.u32 %v5057_v56, %v4134_v55  ;;  %v4327_v3 = vor.u32 %v5105_v61, %v4326_v60  ;;  %v4086_v45 = vld [vmem:[#allocation5 + $0x600] sm:$0xf]  ;;  %v5117_v55 = vld [vmem:[#allocation5 + $0x848] sm:$0xf0]  ;;  %v4554_v56 = vld [vmem:[#allocation5 + $0x9a8] sm:$0xf] }
  0x4d   :  { %2727 = vmatpush.bf16.msrb.mxu0 %v3703_v8  ;;  %v5078_v8 = vld [vmem:[#allocation5 + $0x710] sm:$0xf0]  ;;  %v4182_v49 = vld [vmem:[#allocation5 + $0x6c0] sm:$0xf]  ;;  %v4746_v61 = vld [vmem:[#allocation5 + $0xb28] sm:$0xf] }
  0x4e   :  { %2740 = vmatpush.bf16.msrb.mxu1 %v3799_v13  ;;  %v5126_v13 = vld [vmem:[#allocation5 + $0x890] sm:$0xf0]  ;;  %v4219_v15 = vor.u32 %v5078_v8, %v4218_v6  ;;  %v4278_v51 = vld [vmem:[#allocation5 + $0x780] sm:$0xf]  ;;  %v4183_v0 = vor.u32 %v5069_v50, %v4182_v49  ;;  %v4555_v6 = vor.u32 %v5162_v57, %v4554_v56  ;;  %v85_v8 = vld [vmem:[#allocation2 + $0x48] sm:$0xff] }
  0x4f   :  { %2753 = vmatpush.bf16.msrb.mxu2 %v3895_v14  ;;  %v4123_v14 = vor.u32 %v5054_v5, %v4122_v4  ;;  %v4411_v22 = vor.u32 %v5126_v13, %v4410_v12  ;;  %v5186_v60 = vld [vmem:[#allocation5 + $0xa70] sm:$0xf0]  ;;  %v84_v4 = vld [vmem:[#allocation2 + $0x40] sm:$0xff]  ;;  %v87_v10 = vld [vmem:[#allocation2 + $0x58] sm:$0xff] }
  0x50   :  { %2766 = vmatpush.bf16.msrb.mxu3 %v3991_v20  ;;  %2728 = vmatmul.bf16.vlgmr.msrb.gmra.mxu0 %v5394_v37  ;;  %v5051_v20 = vld [vmem:[#allocation5 + $0x638] sm:$0xf0]  ;;  %v5210_v62 = vld [vmem:[#allocation5 + $0xb30] sm:$0xf0]  ;;  %v4542_v13 = vld [vmem:[#allocation5 + $0x990] sm:$0xf] }
  0x51   :  { %2772 = vmatpush.bf16.msra.mxu0 %v4171_v21  ;;  %2741 = vmatmul.bf16.vlgmr.msrb.gmra.mxu1 %v5398_v40  ;;  %v4206_v21 = vld [vmem:[#allocation5 + $0x6f0] sm:$0xf]  ;;  %v4111_v28 = vor.u32 %v5051_v20, %v4110_v19  ;;  %v4747_v12 = vor.u32 %v5210_v62, %v4746_v61  ;;  %v5404_v19 = vpack.c.bf16 %v84_v4, %v84_v4  ;;  %v5183_v20 = vld [vmem:[#allocation5 + $0xa58] sm:$0xf0]  ;;  %v4530_v31 = vld [vmem:[#allocation5 + $0x978] sm:$0xf] }
  0x52   :  { %2785 = vmatpush.bf16.msra.mxu1 %v4267_v25  ;;  %2754 = vmatmul.bf16.vlgmr.msrb.gmra.mxu2 %v5392_v34  ;;  %v5099_v25 = vld [vmem:[#allocation5 + $0x7b8] sm:$0xf0]  ;;  %v4207_v29 = vor.u32 %v5075_v23, %v4206_v21  ;;  %v4734_v21 = vld [vmem:[#allocation5 + $0xb10] sm:$0xf]  ;;  %v5156_v32 = vld [vmem:[#allocation5 + $0x980] sm:$0xf0] }
  0x53   :  { %2798 = vmatpush.bf16.msra.mxu2 %v4363_v26  ;;  %2767 = vmatmul.bf16.vlgmr.msrb.gmra.mxu3 %v5396_v38  ;;  %v4398_v26 = vld [vmem:[#allocation5 + $0x870] sm:$0xf]  ;;  %v4626_v33 = vld [vmem:[#allocation5 + $0xa38] sm:$0xf]  ;;  %v5180_v36 = vld [vmem:[#allocation5 + $0xa40] sm:$0xf0] }
  0x54   :  { %2811 = vmatpush.bf16.msra.mxu3 %v4459_v30  ;;  %v4303_v30 = vor.u32 %v5099_v25, %v4302_v24  ;;  %v4399_v35 = vor.u32 %v5123_v27, %v4398_v26  ;;  %v5408_v24 = vpack.c.bf16 %v85_v8, %v85_v8  ;;  %v4830_v25 = vld [vmem:[#allocation5 + $0xbd0] sm:$0xf]  ;;  %v5231_v26 = vld [vmem:[#allocation5 + $0xbd8] sm:$0xf0]  ;;  %v5410_v27 = vpack.c.bf16 %v87_v10, %v87_v10  ;;  %v4614_v49 = vld [vmem:[#allocation5 + $0xa20] sm:$0xf] }
  0x55   :  { %2773 = vmatpush.bf16.msra.mxu0 %v4159_v39  ;;  %v4290_v39 = vld [vmem:[#allocation5 + $0x798] sm:$0xf]  ;;  %v4602_v61 = vld [vmem:[#allocation5 + $0xa08] sm:$0xf]  ;;  %v5222_v4 = vld [vmem:[#allocation5 + $0xb90] sm:$0xf0] }
  0x56   :  { %2786 = vmatpush.bf16.msra.mxu1 %v4255_v41  ;;  %v5096_v41 = vld [vmem:[#allocation5 + $0x7a0] sm:$0xf0]  ;;  %v4494_v8 = vld [vmem:[#allocation5 + $0x930] sm:$0xf]  ;;  %v5147_v10 = vld [vmem:[#allocation5 + $0x938] sm:$0xf0] }
  0x57   :  { %2799 = vmatpush.bf16.msra.mxu2 %v4351_v42  ;;  %v4386_v42 = vld [vmem:[#allocation5 + $0x858] sm:$0xf]  ;;  %v4291_v48 = vor.u32 %v5096_v41, %v4290_v39  ;;  %v5204_v41 = vld [vmem:[#allocation5 + $0xb00] sm:$0xf0] }
  0x58   :  { %2812 = vmatpush.bf16.msra.mxu3 %v4447_v46  ;;  %v5045_v46 = vld [vmem:[#allocation5 + $0x608] sm:$0xf0]  ;;  %v4722_v39 = vld [vmem:[#allocation5 + $0xaf8] sm:$0xf] }
  0x59   :  { %2774 = vmatpush.bf16.msra.mxu0 %v4147_v52  ;;  %v4387_v52 = vor.u32 %v5120_v43, %v4386_v42  ;;  %v4087_v59 = vor.u32 %v5045_v46, %v4086_v45  ;;  %v4818_v42 = vld [vmem:[#allocation5 + $0xbb8] sm:$0xf]  ;;  %v5228_v43 = vld [vmem:[#allocation5 + $0xbc0] sm:$0xf0]  ;;  %v4627_v45 = vor.u32 %v5180_v36, %v4626_v33  ;;  %v4723_v46 = vor.u32 %v5204_v41, %v4722_v39  ;;  %v4470_v41 = vld [vmem:[#allocation5 + $0x900] sm:$0xf] }
  0x5a   :  { %2787 = vmatpush.bf16.msra.mxu1 %v4243_v53  ;;  %v5093_v53 = vld [vmem:[#allocation5 + $0x788] sm:$0xf0]  ;;  %v4819_v50 = vor.u32 %v5228_v43, %v4818_v42  ;;  %v5192_v33 = vld [vmem:[#allocation5 + $0xaa0] sm:$0xf0] }
  0x5b   :  { %2800 = vmatpush.bf16.msra.mxu2 %v4339_v54  ;;  %v4374_v54 = vld [vmem:[#allocation5 + $0x840] sm:$0xf]  ;;  %v5216_v36 = vld [vmem:[#allocation5 + $0xb60] sm:$0xf0]  ;;  %v5141_v42 = vld [vmem:[#allocation5 + $0x908] sm:$0xf0] }
  0x5c   :  { %2813 = vmatpush.bf16.msra.mxu3 %v4435_v58  ;;  %v4650_v58 = vld [vmem:[#allocation5 + $0xa68] sm:$0xf]  ;;  %v4375_v5 = vor.u32 %v5117_v55, %v4374_v54  ;;  %v4806_v54 = vld [vmem:[#allocation5 + $0xba0] sm:$0xf]  ;;  %v5225_v55 = vld [vmem:[#allocation5 + $0xba8] sm:$0xf0] }
  0x5d   :  { %2775 = vmatpush.bf16.msra.mxu0 %v4135_v1  ;;  %v4279_v1 = vor.u32 %v5093_v53, %v4278_v51  ;;  %v4651_v11 = vor.u32 %v5186_v60, %v4650_v58  ;;  %v5177_v51 = vld [vmem:[#allocation5 + $0xa28] sm:$0xf0]  ;;  %v5150_v60 = vld [vmem:[#allocation5 + $0x950] sm:$0xf0]  ;;  %v4807_v62 = vor.u32 %v5225_v55, %v4806_v54  ;;  %v4471_v55 = vor.u32 %v5141_v42, %v4470_v41  ;;  %v3572_v41 = vld [vmem:[#allocation5 + $0x204] sm:$0xf0] }
  0x5e   :  { %2788 = vmatpush.bf16.msra.mxu1 %v4231_v2  ;;  %v4842_v2 = vld [vmem:[#allocation5 + $0xbe8] sm:$0xf]  ;;  %v5201_v53 = vld [vmem:[#allocation5 + $0xae8] sm:$0xf0]  ;;  %v4615_v57 = vor.u32 %v5177_v51, %v4614_v49  ;;  %v4939_v42 = vld [vmem:[#allocation5 + $0x2bc] sm:$0xf] }
  0x5f   :  { %2801 = vmatpush.bf16.msra.mxu2 %v4327_v3  ;;  %v5234_v3 = vld [vmem:[#allocation5 + $0xbf0] sm:$0xf0]  ;;  %v5189_v49 = vld [vmem:[#allocation5 + $0xa88] sm:$0xf0] }
  0x60   :  { %2814 = vmatpush.bf16.msra.mxu3 %v4423_v7  ;;  %v86_v7 = vld [vmem:[#allocation2 + $0x50] sm:$0xff]  ;;  %v5213_v51 = vld [vmem:[#allocation5 + $0xb48] sm:$0xf0] }
  0x61   :  { %2776 = vmatpush.bf16.msra.mxu0 %v4123_v14  ;;  %v5159_v14 = vld [vmem:[#allocation5 + $0x998] sm:$0xf0]  ;;  %v5406_v23 = vpack.c.bf16 %v86_v7, %v86_v7  ;;  %v4897_v54 = vld [vmem:[#allocation5 + $0x16c] sm:$0xf] }
  0x62   :  { %2789 = vmatpush.bf16.msra.mxu1 %v4219_v15  ;;  %v4638_v15 = vld [vmem:[#allocation5 + $0xa50] sm:$0xf] }
  0x63   :  { %2802 = vmatpush.bf16.msra.mxu2 %v4315_v18  ;;  %v4843_v18 = vor.u32 %v5234_v3, %v4842_v2  ;;  %v5198_v2 = vld [vmem:[#allocation5 + $0xad0] sm:$0xf0]  ;;  %v4794_v3 = vld [vmem:[#allocation5 + $0xb88] sm:$0xf] }
  0x64   :  { %2815 = vmatpush.bf16.msra.mxu3 %v4411_v22  ;;  %v5207_v22 = vld [vmem:[#allocation5 + $0xb18] sm:$0xf0] }
  0x65   :  { %2777 = vmatpush.bf16.msra.mxu0 %v4111_v28  ;;  %v4543_v28 = vor.u32 %v5159_v14, %v4542_v13  ;;  %v5171_v13 = vld [vmem:[#allocation5 + $0x9f8] sm:$0xf0]  ;;  %v4686_v14 = vld [vmem:[#allocation5 + $0xab0] sm:$0xf] }
  0x66   :  { %2790 = vmatpush.bf16.msra.mxu1 %v4207_v29  ;;  %v4639_v29 = vor.u32 %v5183_v20, %v4638_v15  ;;  %v5195_v15 = vld [vmem:[#allocation5 + $0xab8] sm:$0xf0] }
  0x67   :  { %2803 = vmatpush.bf16.msra.mxu2 %v4303_v30  ;;  %v4735_v30 = vor.u32 %v5207_v22, %v4734_v21  ;;  %v5219_v20 = vld [vmem:[#allocation5 + $0xb78] sm:$0xf0]  ;;  %v4495_v21 = vor.u32 %v5147_v10, %v4494_v8  ;;  %v4870_v8 = vld [vmem:[#allocation5 + $0x94] sm:$0xf]  ;;  %v3392_v10 = vld [vmem:[#allocation5 + $0x9c] sm:$0xf0] }
  0x68   :  { %2816 = vmatpush.bf16.msra.mxu3 %v4399_v35  ;;  %v4831_v35 = vor.u32 %v5231_v26, %v4830_v25  ;;  %v4687_v25 = vor.u32 %v5195_v15, %v4686_v14  ;;  %v4482_v26 = vld [vmem:[#allocation5 + $0x918] sm:$0xf]  ;;  %v3488_v14 = vld [vmem:[#allocation5 + $0x15c] sm:$0xf0]  ;;  %v4918_v15 = vld [vmem:[#allocation5 + $0x214] sm:$0xf] }
  0x69   :  { %2778 = vmatpush.bf16.msra.mxu0 %v4099_v44  ;;  %v4531_v44 = vor.u32 %v5156_v32, %v4530_v31  ;;  %v5168_v31 = vld [vmem:[#allocation5 + $0x9e0] sm:$0xf0]  ;;  %v4674_v32 = vld [vmem:[#allocation5 + $0xa98] sm:$0xf] }
  0x6a   :  { %2791 = vmatpush.bf16.msra.mxu1 %v4195_v47  ;;  %v4518_v47 = vld [vmem:[#allocation5 + $0x960] sm:$0xf] }
  0x6b   :  { %2804 = vmatpush.bf16.msra.mxu2 %v4291_v48  ;;  %v5153_v48 = vld [vmem:[#allocation5 + $0x968] sm:$0xf0] }
  0x6c   :  { %2817 = vmatpush.bf16.msra.mxu3 %v4387_v52  ;;  %v4710_v52 = vld [vmem:[#allocation5 + $0xae0] sm:$0xf]  ;;  %v4519_v56 = vor.u32 %v5153_v48, %v4518_v47 }
  0x6d   :  { %2779 = vmatpush.bf16.msra.mxu0 %v4087_v59  ;;  %v4711_v58 = vor.u32 %v5201_v53, %v4710_v52  ;;  %v4506_v59 = vld [vmem:[#allocation5 + $0x948] sm:$0xf]  ;;  %v4662_v47 = vld [vmem:[#allocation5 + $0xa80] sm:$0xf]  ;;  %v4873_v52 = vld [vmem:[#allocation5 + $0xac] sm:$0xf] }
  0x6e   :  { %2792 = vmatpush.bf16.msra.mxu1 %v4183_v0  ;;  %v5174_v0 = vld [vmem:[#allocation5 + $0xa10] sm:$0xf0]  ;;  %v3404_v53 = vld [vmem:[#allocation5 + $0xb4] sm:$0xf0] }
  0x6f   :  { %2805 = vmatpush.bf16.msra.mxu2 %v4279_v1  ;;  %v4698_v1 = vld [vmem:[#allocation5 + $0xac8] sm:$0xf] }
  0x70   :  { %2818 = vmatpush.bf16.msra.mxu3 %v4375_v5  ;;  %2780 = vmatmul.bf16.vlgmr.msra.gmra.mxu0 %v5404_v19  ;;  %v4507_v5 = vor.u32 %v5150_v60, %v4506_v59  ;;  %v4699_v7 = vor.u32 %v5198_v2, %v4698_v1  ;;  %v4663_v60 = vor.u32 %v5189_v49, %v4662_v47  ;;  %v4864_v47 = vld [vmem:[#allocation5 + $0x64] sm:$0xf] }
  0x71   :  { %2824 = vmatpush.bf16.msrb.mxu0 %v4555_v6  ;;  %2793 = vmatmul.bf16.vlgmr.msra.gmra.mxu1 %v5408_v24  ;;  %v4603_v6 = vor.u32 %v5174_v0, %v4602_v61  ;;  %v4945_v61 = vld [vmem:[#allocation5 + $0x2ec] sm:$0xf]  ;;  %v88_v0 = vld [vmem:[#allocation2 + $0x60] sm:$0xff]  ;;  %v3407_v2 = vor.u32 %v4873_v52, %v3404_v53  ;;  %v3560_v53 = vld [vmem:[#allocation5 + $0x1ec] sm:$0xf0] }
  0x72   :  { %2837 = vmatpush.bf16.msrb.mxu1 %v4651_v11  ;;  %2806 = vmatmul.bf16.vlgmr.msra.gmra.mxu2 %v5406_v23  ;;  %v4590_v11 = vld [vmem:[#allocation5 + $0x9f0] sm:$0xf]  ;;  %v4888_v49 = vld [vmem:[#allocation5 + $0x124] sm:$0xf] }
  0x73   :  { %2850 = vmatpush.bf16.msrb.mxu2 %v4747_v12  ;;  %2819 = vmatmul.bf16.vlgmr.msra.gmra.mxu3 %v5410_v27  ;;  %v4795_v12 = vor.u32 %v5222_v4, %v4794_v3  ;;  %v4591_v22 = vor.u32 %v5171_v13, %v4590_v11  ;;  %v90_v3 = vld [vmem:[#allocation2 + $0x70] sm:$0xff]  ;;  %v89_v4 = vld [vmem:[#allocation2 + $0x68] sm:$0xff]  ;;  %v5416_v13 = vpack.c.bf16 %v88_v0, %v88_v0  ;;  %v4912_v52 = vld [vmem:[#allocation5 + $0x1e4] sm:$0xf] }
  0x74   :  { %2863 = vmatpush.bf16.msrb.mxu3 %v4843_v18  ;;  %v4782_v18 = vld [vmem:[#allocation5 + $0xb70] sm:$0xf]  ;;  %v4894_v11 = vld [vmem:[#allocation5 + $0x154] sm:$0xf]  ;;  %v3452_v0 = vld [vmem:[#allocation5 + $0x114] sm:$0xf0] }
  0x75   :  { %2825 = vmatpush.bf16.msrb.mxu0 %v4543_v28  ;;  %v5144_v28 = vld [vmem:[#allocation5 + $0x920] sm:$0xf0] }
  0x76   :  { %2838 = vmatpush.bf16.msrb.mxu1 %v4639_v29  ;;  %v4578_v29 = vld [vmem:[#allocation5 + $0x9d8] sm:$0xf]  ;;  %v4483_v39 = vor.u32 %v5144_v28, %v4482_v26  ;;  %v3395_v28 = vor.u32 %v4870_v8, %v3392_v10  ;;  %v4858_v8 = vld [vmem:[#allocation5 + $0x34] sm:$0xf]  ;;  %v3344_v10 = vld [vmem:[#allocation5 + $0x3c] sm:$0xf0] }
  0x77   :  { %2851 = vmatpush.bf16.msrb.mxu2 %v4735_v30  ;;  %v4783_v30 = vor.u32 %v5219_v20, %v4782_v18  ;;  %v4579_v43 = vor.u32 %v5168_v31, %v4578_v29  ;;  %v3584_v18 = vld [vmem:[#allocation5 + $0x21c] sm:$0xf0]  ;;  %v5418_v20 = vpack.c.bf16 %v90_v3, %v90_v3  ;;  %v3491_v29 = vor.u32 %v4894_v11, %v3488_v14  ;;  %v4867_v31 = vld [vmem:[#allocation5 + $0x7c] sm:$0xf]  ;;  %v4933_v3 = vld [vmem:[#allocation5 + $0x28c] sm:$0xf] }
  0x78   :  { %2864 = vmatpush.bf16.msrb.mxu3 %v4831_v35  ;;  %v4770_v35 = vld [vmem:[#allocation5 + $0xb58] sm:$0xf]  ;;  %v4882_v11 = vld [vmem:[#allocation5 + $0xf4] sm:$0xf]  ;;  %v3440_v14 = vld [vmem:[#allocation5 + $0xfc] sm:$0xf0] }
  0x79   :  { %2826 = vmatpush.bf16.msrb.mxu0 %v4531_v44  ;;  %v4675_v44 = vor.u32 %v5192_v33, %v4674_v32  ;;  %v4771_v48 = vor.u32 %v5216_v36, %v4770_v35  ;;  %v3380_v32 = vld [vmem:[#allocation5 + $0x84] sm:$0xf0]  ;;  %v4891_v33 = vld [vmem:[#allocation5 + $0x13c] sm:$0xf] }
  0x7a   :  { %2839 = vmatpush.bf16.msrb.mxu1 %v4627_v45  ;;  %v4566_v45 = vld [vmem:[#allocation5 + $0x9c0] sm:$0xf]  ;;  %v3476_v36 = vld [vmem:[#allocation5 + $0x144] sm:$0xf0] }
  0x7b   :  { %2852 = vmatpush.bf16.msrb.mxu2 %v4723_v46  ;;  %v5165_v46 = vld [vmem:[#allocation5 + $0x9c8] sm:$0xf0] }
  0x7c   :  { %2865 = vmatpush.bf16.msrb.mxu3 %v4819_v50  ;;  %v4758_v50 = vld [vmem:[#allocation5 + $0xb40] sm:$0xf]  ;;  %v4567_v59 = vor.u32 %v5165_v46, %v4566_v45  ;;  %v3479_v45 = vor.u32 %v4891_v33, %v3476_v36  ;;  %v4879_v33 = vld [vmem:[#allocation5 + $0xdc] sm:$0xf]  ;;  %v3428_v36 = vld [vmem:[#allocation5 + $0xe4] sm:$0xf0] }
  0x7d   :  { %2827 = vmatpush.bf16.msrb.mxu0 %v4519_v56  ;;  %v3500_v56 = vld [vmem:[#allocation5 + $0x174] sm:$0xf0]  ;;  %v4759_v1 = vor.u32 %v5213_v51, %v4758_v50  ;;  %v3464_v51 = vld [vmem:[#allocation5 + $0x12c] sm:$0xf0] }
  0x7e   :  { %2840 = vmatpush.bf16.msrb.mxu1 %v4615_v57  ;;  %v4921_v57 = vld [vmem:[#allocation5 + $0x22c] sm:$0xf] }
  0x7f   :  { %2853 = vmatpush.bf16.msrb.mxu2 %v4711_v58  ;;  %v3596_v58 = vld [vmem:[#allocation5 + $0x234] sm:$0xf0] }
  0x80   :  { %2866 = vmatpush.bf16.msrb.mxu3 %v4807_v62  ;;  %v3692_v62 = vld [vmem:[#allocation5 + $0x2f4] sm:$0xf0] }
  0x81   :  { %2828 = vmatpush.bf16.msrb.mxu0 %v4507_v5  ;;  %v91_v5 = vld [vmem:[#allocation2 + $0x78] sm:$0xff] }
  0x82   :  { %2841 = vmatpush.bf16.msrb.mxu1 %v4603_v6  ;;  %v3503_v6 = vor.u32 %v4897_v54, %v3500_v56  ;;  %v5422_v26 = vpack.c.bf16 %v91_v5, %v91_v5  ;;  %v4936_v54 = vld [vmem:[#allocation5 + $0x2a4] sm:$0xf] }
  0x83   :  { %2854 = vmatpush.bf16.msrb.mxu2 %v4699_v7  ;;  %v3599_v7 = vor.u32 %v4921_v57, %v3596_v58  ;;  %v3467_v57 = vor.u32 %v4888_v49, %v3464_v51  ;;  %v3563_v58 = vor.u32 %v4912_v52, %v3560_v53  ;;  %v4876_v49 = vld [vmem:[#allocation5 + $0xc4] sm:$0xf]  ;;  %v3512_v53 = vld [vmem:[#allocation5 + $0x18c] sm:$0xf0] }
  0x84   :  { %2867 = vmatpush.bf16.msrb.mxu3 %v4795_v12  ;;  %v3695_v12 = vor.u32 %v4945_v61, %v3692_v62  ;;  %v4885_v61 = vld [vmem:[#allocation5 + $0x10c] sm:$0xf]  ;;  %v4900_v51 = vld [vmem:[#allocation5 + $0x184] sm:$0xf] }
  0x85   :  { %2829 = vmatpush.bf16.msrb.mxu0 %v4495_v21  ;;  %v5420_v21 = vpack.c.bf16 %v89_v4, %v89_v4  ;;  %v3644_v4 = vld [vmem:[#allocation5 + $0x294] sm:$0xf0] }
  0x86   :  { %2842 = vmatpush.bf16.msrb.mxu1 %v4591_v22  ;;  %v4942_v22 = vld [vmem:[#allocation5 + $0x2d4] sm:$0xf] }
  0x87   :  { %2855 = vmatpush.bf16.msrb.mxu2 %v4687_v25  ;;  %v3680_v25 = vld [vmem:[#allocation5 + $0x2dc] sm:$0xf0] }
  0x88   :  { %2868 = vmatpush.bf16.msrb.mxu3 %v4783_v30  ;;  %v3587_v30 = vor.u32 %v4918_v15, %v3584_v18  ;;  %v3683_v35 = vor.u32 %v4942_v22, %v3680_v25  ;;  %v4906_v15 = vld [vmem:[#allocation5 + $0x1b4] sm:$0xf]  ;;  %v3536_v18 = vld [vmem:[#allocation5 + $0x1bc] sm:$0xf0] }
  0x89   :  { %2830 = vmatpush.bf16.msrb.mxu0 %v4483_v39  ;;  %v4915_v39 = vld [vmem:[#allocation5 + $0x1fc] sm:$0xf]  ;;  %v4930_v22 = vld [vmem:[#allocation5 + $0x274] sm:$0xf]  ;;  %v3632_v25 = vld [vmem:[#allocation5 + $0x27c] sm:$0xf0] }
  0x8a   :  { %2843 = vmatpush.bf16.msrb.mxu1 %v4579_v43  ;;  %v3668_v43 = vld [vmem:[#allocation5 + $0x2c4] sm:$0xf0]  ;;  %v3575_v46 = vor.u32 %v4915_v39, %v3572_v41  ;;  %v4903_v39 = vld [vmem:[#allocation5 + $0x19c] sm:$0xf] }
  0x8b   :  { %2856 = vmatpush.bf16.msrb.mxu2 %v4675_v44  ;;  %v3383_v44 = vor.u32 %v4867_v31, %v3380_v32  ;;  %v3671_v50 = vor.u32 %v4939_v42, %v3668_v43  ;;  %v4855_v31 = vld [vmem:[#allocation5 + $0x1c] sm:$0xf]  ;;  %v3332_v32 = vld [vmem:[#allocation5 + $0x24] sm:$0xf0] }
  0x8c   :  { %2869 = vmatpush.bf16.msrb.mxu3 %v4771_v48  ;;  %v3368_v48 = vld [vmem:[#allocation5 + $0x6c] sm:$0xf0]  ;;  %v3524_v41 = vld [vmem:[#allocation5 + $0x1a4] sm:$0xf0]  ;;  %v4927_v42 = vld [vmem:[#allocation5 + $0x25c] sm:$0xf] }
  0x8d   :  { %2831 = vmatpush.bf16.msrb.mxu0 %v4471_v55  ;;  %v3656_v55 = vld [vmem:[#allocation5 + $0x2ac] sm:$0xf0]  ;;  %v3371_v56 = vor.u32 %v4864_v47, %v3368_v48  ;;  %v3620_v43 = vld [vmem:[#allocation5 + $0x264] sm:$0xf0]  ;;  %v3431_v47 = vor.u32 %v4879_v33, %v3428_v36  ;;  %v3527_v48 = vor.u32 %v4903_v39, %v3524_v41  ;;  %v4987_v33 = vld [vmem:[#allocation5 + $0x43c] sm:$0xf] }
  0x8e   :  { %2844 = vmatpush.bf16.msrb.mxu1 %v4567_v59  ;;  %v4861_v59 = vld [vmem:[#allocation5 + $0x4c] sm:$0xf]  ;;  %v3659_v62 = vor.u32 %v4936_v54, %v3656_v55  ;;  %v3623_v52 = vor.u32 %v4927_v42, %v3620_v43  ;;  %v4924_v54 = vld [vmem:[#allocation5 + $0x244] sm:$0xf]  ;;  %v3608_v55 = vld [vmem:[#allocation5 + $0x24c] sm:$0xf0] }
  0x8f   :  { %2857 = vmatpush.bf16.msrb.mxu2 %v4663_v60  ;;  %v3356_v60 = vld [vmem:[#allocation5 + $0x54] sm:$0xf0]  ;;  %v3860_v36 = vld [vmem:[#allocation5 + $0x444] sm:$0xf0]  ;;  %v5011_v39 = vld [vmem:[#allocation5 + $0x4fc] sm:$0xf] }
  0x90   :  { %2870 = vmatpush.bf16.msrb.mxu3 %v4759_v1  ;;  %2832 = vmatmul.bf16.vlgmr.msrb.gmra.mxu0 %v5416_v13  ;;  %v4909_v1 = vld [vmem:[#allocation5 + $0x1cc] sm:$0xf]  ;;  %v3359_v5 = vor.u32 %v4861_v59, %v3356_v60  ;;  %v3884_v60 = vld [vmem:[#allocation5 + $0x474] sm:$0xf0]  ;;  %v3956_v41 = vld [vmem:[#allocation5 + $0x504] sm:$0xf0] }
  0x91   :  { %2876 = vmatpush.bf16.msra.mxu0 %v3407_v2  ;;  %2845 = vmatmul.bf16.vlgmr.msrb.gmra.mxu1 %v5420_v21  ;;  %v3548_v2 = vld [vmem:[#allocation5 + $0x1d4] sm:$0xf0]  ;;  %v5035_v42 = vld [vmem:[#allocation5 + $0x5bc] sm:$0xf]  ;;  %v4052_v43 = vld [vmem:[#allocation5 + $0x5c4] sm:$0xf0] }
  0x92   :  { %2889 = vmatpush.bf16.msra.mxu1 %v3503_v6  ;;  %2858 = vmatmul.bf16.vlgmr.msrb.gmra.mxu2 %v5418_v20  ;;  %v3455_v6 = vor.u32 %v4885_v61, %v3452_v0  ;;  %v5017_v61 = vld [vmem:[#allocation5 + $0x52c] sm:$0xf] }
  0x93   :  { %2902 = vmatpush.bf16.msra.mxu2 %v3599_v7  ;;  %2871 = vmatmul.bf16.vlgmr.msrb.gmra.mxu3 %v5422_v26  ;;  %v3551_v7 = vor.u32 %v4909_v1, %v3548_v2  ;;  %v3515_v1 = vor.u32 %v4900_v51, %v3512_v53  ;;  %v5041_v2 = vld [vmem:[#allocation5 + $0x5ec] sm:$0xf]  ;;  %v3848_v51 = vld [vmem:[#allocation5 + $0x42c] sm:$0xf0] }
  0x94   :  { %2915 = vmatpush.bf16.msra.mxu3 %v3695_v12  ;;  %v3647_v12 = vor.u32 %v4933_v3, %v3644_v4  ;;  %v4076_v3 = vld [vmem:[#allocation5 + $0x5f4] sm:$0xf0]  ;;  %v3611_v4 = vor.u32 %v4924_v54, %v3608_v55  ;;  %v3944_v53 = vld [vmem:[#allocation5 + $0x4ec] sm:$0xf0]  ;;  %v5032_v54 = vld [vmem:[#allocation5 + $0x5a4] sm:$0xf] }
  0x95   :  { %2877 = vmatpush.bf16.msra.mxu0 %v3395_v28  ;;  %v3347_v28 = vor.u32 %v4858_v8, %v3344_v10  ;;  %v4966_v8 = vld [vmem:[#allocation5 + $0x394] sm:$0xf]  ;;  %v3776_v10 = vld [vmem:[#allocation5 + $0x39c] sm:$0xf0]  ;;  %v4040_v55 = vld [vmem:[#allocation5 + $0x5ac] sm:$0xf0] }
  0x96   :  { %2890 = vmatpush.bf16.msra.mxu1 %v3491_v29  ;;  %v3443_v29 = vor.u32 %v4882_v11, %v3440_v14  ;;  %v4990_v11 = vld [vmem:[#allocation5 + $0x454] sm:$0xf]  ;;  %v3872_v14 = vld [vmem:[#allocation5 + $0x45c] sm:$0xf0] }
  0x97   :  { %2903 = vmatpush.bf16.msra.mxu2 %v3587_v30  ;;  %v3539_v30 = vor.u32 %v4906_v15, %v3536_v18  ;;  %v5014_v15 = vld [vmem:[#allocation5 + $0x514] sm:$0xf]  ;;  %v3968_v18 = vld [vmem:[#allocation5 + $0x51c] sm:$0xf0] }
  0x98   :  { %2916 = vmatpush.bf16.msra.mxu3 %v3683_v35  ;;  %v3635_v35 = vor.u32 %v4930_v22, %v3632_v25  ;;  %v5038_v22 = vld [vmem:[#allocation5 + $0x5d4] sm:$0xf]  ;;  %v4064_v25 = vld [vmem:[#allocation5 + $0x5dc] sm:$0xf0] }
  0x99   :  { %2878 = vmatpush.bf16.msra.mxu0 %v3383_v44  ;;  %v3335_v44 = vor.u32 %v4855_v31, %v3332_v32  ;;  %v4963_v31 = vld [vmem:[#allocation5 + $0x37c] sm:$0xf]  ;;  %v3764_v32 = vld [vmem:[#allocation5 + $0x384] sm:$0xf0] }
  0x9a   :  { %2891 = vmatpush.bf16.msra.mxu1 %v3479_v45  ;;  %v4852_v45 = vld [vmem:[#allocation5 + $0x4] sm:$0xf] }
  0x9b   :  { %2904 = vmatpush.bf16.msra.mxu2 %v3575_v46  ;;  %v3320_v46 = vld [vmem:[#allocation5 + $0xc] sm:$0xf0] }
  0x9c   :  { %2917 = vmatpush.bf16.msra.mxu3 %v3671_v50  ;;  %v3416_v50 = vld [vmem:[#allocation5 + $0xcc] sm:$0xf0]  ;;  %v3323_v59 = vor.u32 %v4852_v45, %v3320_v46  ;;  %v3863_v45 = vor.u32 %v4987_v33, %v3860_v36  ;;  %v3959_v46 = vor.u32 %v5011_v39, %v3956_v41  ;;  %v4951_v36 = vld [vmem:[#allocation5 + $0x31c] sm:$0xf]  ;;  %v3716_v39 = vld [vmem:[#allocation5 + $0x324] sm:$0xf0] }
  0x9d   :  { %2879 = vmatpush.bf16.msra.mxu0 %v3371_v56  ;;  %v4969_v56 = vld [vmem:[#allocation5 + $0x3ac] sm:$0xf]  ;;  %v3419_v0 = vor.u32 %v4876_v49, %v3416_v50  ;;  %v4984_v49 = vld [vmem:[#allocation5 + $0x424] sm:$0xf]  ;;  %v4055_v50 = vor.u32 %v5035_v42, %v4052_v43  ;;  %v4975_v41 = vld [vmem:[#allocation5 + $0x3dc] sm:$0xf] }
  0x9e   :  { %2892 = vmatpush.bf16.msra.mxu1 %v3467_v57  ;;  %v3788_v57 = vld [vmem:[#allocation5 + $0x3b4] sm:$0xf0]  ;;  %v3812_v43 = vld [vmem:[#allocation5 + $0x3e4] sm:$0xf0] }
  0x9f   :  { %2905 = vmatpush.bf16.msra.mxu2 %v3563_v58  ;;  %v4993_v58 = vld [vmem:[#allocation5 + $0x46c] sm:$0xf] }
  0xa0   :  { %2918 = vmatpush.bf16.msra.mxu3 %v3659_v62  ;;  %v3980_v62 = vld [vmem:[#allocation5 + $0x534] sm:$0xf0] }
  0xa1   :  { %2880 = vmatpush.bf16.msra.mxu0 %v3359_v5  ;;  %v3791_v5 = vor.u32 %v4969_v56, %v3788_v57  ;;  %v3851_v57 = vor.u32 %v4984_v49, %v3848_v51  ;;  %v4948_v51 = vld [vmem:[#allocation5 + $0x304] sm:$0xf] }
  0xa2   :  { %2893 = vmatpush.bf16.msra.mxu1 %v3455_v6  ;;  %v3887_v6 = vor.u32 %v4993_v58, %v3884_v60  ;;  %v3740_v60 = vld [vmem:[#allocation5 + $0x354] sm:$0xf0] }
  0xa3   :  { %2906 = vmatpush.bf16.msra.mxu2 %v3551_v7  ;;  %v3983_v7 = vor.u32 %v5017_v61, %v3980_v62  ;;  %v4981_v61 = vld [vmem:[#allocation5 + $0x40c] sm:$0xf]  ;;  %v4043_v62 = vor.u32 %v5032_v54, %v4040_v55  ;;  %v3815_v54 = vor.u32 %v4975_v41, %v3812_v43  ;;  %v4448_v41 = vld [vmem:[#allocation5 + $0x8dc] sm:$0xf0] }
  0xa4   :  { %2919 = vmatpush.bf16.msra.mxu3 %v3647_v12  ;;  %v4079_v12 = vor.u32 %v5041_v2, %v4076_v3  ;;  %v3932_v2 = vld [vmem:[#allocation5 + $0x4d4] sm:$0xf0]  ;;  %v5029_v3 = vld [vmem:[#allocation5 + $0x58c] sm:$0xf] }
  0xa5   :  { %2881 = vmatpush.bf16.msra.mxu0 %v3347_v28  ;;  %v3779_v28 = vor.u32 %v4966_v8, %v3776_v10  ;;  %v4954_v10 = vld [vmem:[#allocation5 + $0x334] sm:$0xf] }
  0xa6   :  { %2894 = vmatpush.bf16.msra.mxu1 %v3443_v29  ;;  %v3875_v29 = vor.u32 %v4990_v11, %v3872_v14  ;;  %v3728_v11 = vld [vmem:[#allocation5 + $0x33c] sm:$0xf0] }
  0xa7   :  { %2907 = vmatpush.bf16.msra.mxu2 %v3539_v30  ;;  %v3971_v30 = vor.u32 %v5014_v15, %v3968_v18  ;;  %v3824_v15 = vld [vmem:[#allocation5 + $0x3fc] sm:$0xf0]  ;;  %v5002_v18 = vld [vmem:[#allocation5 + $0x4b4] sm:$0xf] }
  0xa8   :  { %2920 = vmatpush.bf16.msra.mxu3 %v3635_v35  ;;  %v4067_v35 = vor.u32 %v5038_v22, %v4064_v25  ;;  %v3920_v22 = vld [vmem:[#allocation5 + $0x4bc] sm:$0xf0]  ;;  %v5026_v25 = vld [vmem:[#allocation5 + $0x574] sm:$0xf] }
  0xa9   :  { %2882 = vmatpush.bf16.msra.mxu0 %v3335_v44  ;;  %v3767_v44 = vor.u32 %v4963_v31, %v3764_v32  ;;  %v3731_v31 = vor.u32 %v4954_v10, %v3728_v11 }
  0xaa   :  { %2895 = vmatpush.bf16.msra.mxu1 %v3431_v47  ;;  %v4960_v47 = vld [vmem:[#allocation5 + $0x364] sm:$0xf] }
  0xab   :  { %2908 = vmatpush.bf16.msra.mxu2 %v3527_v48  ;;  %v3752_v48 = vld [vmem:[#allocation5 + $0x36c] sm:$0xf0] }
  0xac   :  { %2921 = vmatpush.bf16.msra.mxu3 %v3623_v52  ;;  %v5008_v52 = vld [vmem:[#allocation5 + $0x4e4] sm:$0xf]  ;;  %v3755_v56 = vor.u32 %v4960_v47, %v3752_v48  ;;  %v5023_v47 = vld [vmem:[#allocation5 + $0x55c] sm:$0xf]  ;;  %v4004_v48 = vld [vmem:[#allocation5 + $0x564] sm:$0xf0] }
  0xad   :  { %2883 = vmatpush.bf16.msra.mxu0 %v3323_v59  ;;  %v3947_v58 = vor.u32 %v5008_v52, %v3944_v53  ;;  %v4957_v59 = vld [vmem:[#allocation5 + $0x34c] sm:$0xf]  ;;  %v3704_v52 = vld [vmem:[#allocation5 + $0x30c] sm:$0xf0] }
  0xae   :  { %2896 = vmatpush.bf16.msra.mxu1 %v3419_v0  ;;  %v3836_v0 = vld [vmem:[#allocation5 + $0x414] sm:$0xf0] }
  0xaf   :  { %2909 = vmatpush.bf16.msra.mxu2 %v3515_v1  ;;  %v5005_v1 = vld [vmem:[#allocation5 + $0x4cc] sm:$0xf] }
  0xb0   :  { %2922 = vmatpush.bf16.msra.mxu3 %v3611_v4  ;;  %2884 = vmatmul.bf16.vlgmr.msra.gmra.mxu0 %v5383_v9  ;;  %v4028_v4 = vld [vmem:[#allocation5 + $0x594] sm:$0xf0]  ;;  %v3935_v8 = vor.u32 %v5005_v1, %v3932_v2  ;;  %v5089_v2 = vld [vmem:[#allocation5 + $0x76c] sm:$0xf] }
  0xb1   :  { %2928 = vmatpush.bf16.msrb.mxu0 %v3791_v5  ;;  %2897 = vmatmul.bf16.vlgmr.msra.gmra.mxu1 %v5387_v17  ;;  %v3743_v5 = vor.u32 %v4957_v59, %v3740_v60  ;;  %v4031_v14 = vor.u32 %v5029_v3, %v4028_v4  ;;  %v4007_v59 = vor.u32 %v5023_v47, %v4004_v48  ;;  %v3896_v60 = vld [vmem:[#allocation5 + $0x48c] sm:$0xf0]  ;;  %v4172_v1 = vld [vmem:[#allocation5 + $0x6b4] sm:$0xf0]  ;;  %v4148_v47 = vld [vmem:[#allocation5 + $0x684] sm:$0xf0] }
  0xb2   :  { %2941 = vmatpush.bf16.msrb.mxu1 %v3887_v6  ;;  %2910 = vmatmul.bf16.vlgmr.msra.gmra.mxu2 %v5380_v63  ;;  %v2677_v6 = vpop.f32.mrf.mxu0  ;;  %v5083_v48 = vld [vmem:[#allocation5 + $0x73c] sm:$0xf] }
  0xb3   :  { %2954 = vmatpush.bf16.msrb.mxu2 %v3983_v7  ;;  %2923 = vmatmul.bf16.vlgmr.msra.gmra.mxu3 %v5385_v16  ;;  %v3839_v7 = vor.u32 %v4981_v61, %v3836_v0  ;;  %v5020_v61 = vld [vmem:[#allocation5 + $0x544] sm:$0xf]  ;;  %v5065_v0 = vld [vmem:[#allocation5 + $0x6ac] sm:$0xf] }
  0xb4   :  { %2967 = vmatpush.bf16.msrb.mxu3 %v4079_v12  ;;  %v4978_v12 = vld [vmem:[#allocation5 + $0x3f4] sm:$0xf] }
  0xb5   :  { %2929 = vmatpush.bf16.msrb.mxu0 %v3779_v28  ;;  %v4016_v28 = vld [vmem:[#allocation5 + $0x57c] sm:$0xf0]  ;;  %v3827_v33 = vor.u32 %v4978_v12, %v3824_v15  ;;  %v5137_v12 = vld [vmem:[#allocation5 + $0x8ec] sm:$0xf] }
  0xb6   :  { %2942 = vmatpush.bf16.msrb.mxu1 %v3875_v29  ;;  %v2690_v29 = vpop.f32.mrf.mxu1  ;;  %v4019_v42 = vor.u32 %v5026_v25, %v4016_v28  ;;  %v5434_v49 = vpop.f32.mrf.mxu3  ;;  %v5062_v28 = vld [vmem:[#allocation5 + $0x694] sm:$0xf] }
  0xb7   :  { %2955 = vmatpush.bf16.msrb.mxu2 %v3971_v30  ;;  %v2703_v30 = vpop.f32.mrf.mxu2  ;;  %v2691_v32 = vadd.f32 %v2690_v29, %v2677_v6  ;;  %v4268_v6 = vld [vmem:[#allocation5 + $0x774] sm:$0xf0]  ;;  %v4160_v29 = vld [vmem:[#allocation5 + $0x69c] sm:$0xf0] }
  0xb8   :  { %2968 = vmatpush.bf16.msrb.mxu3 %v4067_v35  ;;  %v3923_v35 = vor.u32 %v5002_v18, %v3920_v22  ;;  %v4175_v18 = vor.u32 %v5065_v0, %v4172_v1  ;;  %v4271_v22 = vor.u32 %v5089_v2, %v4268_v6  ;;  %v4232_v0 = vld [vmem:[#allocation5 + $0x72c] sm:$0xf0]  ;;  %v5104_v1 = vld [vmem:[#allocation5 + $0x7e4] sm:$0xf] }
  0xb9   :  { %2930 = vmatpush.bf16.msrb.mxu0 %v3767_v44  ;;  %v4999_v44 = vld [vmem:[#allocation5 + $0x49c] sm:$0xf]  ;;  %v4328_v2 = vld [vmem:[#allocation5 + $0x7ec] sm:$0xf0] }
  0xba   :  { %2943 = vmatpush.bf16.msrb.mxu1 %v3863_v45  ;;  %v3908_v45 = vld [vmem:[#allocation5 + $0x4a4] sm:$0xf0]  ;;  %v2679_v53 = vpop.f32.mrf.mxu0 }
  0xbb   :  { %2956 = vmatpush.bf16.msrb.mxu2 %v3959_v46  ;;  %v5432_v46 = vadd.f32 %v2703_v30, %v2691_v32  ;;  %v3911_v55 = vor.u32 %v4999_v44, %v3908_v45  ;;  %v5086_v30 = vld [vmem:[#allocation5 + $0x754] sm:$0xf]  ;;  %v5059_v45 = vld [vmem:[#allocation5 + $0x67c] sm:$0xf]  ;;  %v4340_v53 = vld [vmem:[#allocation5 + $0x804] sm:$0xf0] }
  0xbc   :  { %2969 = vmatpush.bf16.msrb.mxu3 %v4055_v50  ;;  %v3719_v50 = vor.u32 %v4951_v36, %v3716_v39  ;;  %v4352_v36 = vld [vmem:[#allocation5 + $0x81c] sm:$0xf0]  ;;  %v5134_v39 = vld [vmem:[#allocation5 + $0x8d4] sm:$0xf] }
  0xbd   :  { %2931 = vmatpush.bf16.msrb.mxu0 %v3755_v56  ;;  %v4972_v56 = vld [vmem:[#allocation5 + $0x3c4] sm:$0xf] }
  0xbe   :  { %2944 = vmatpush.bf16.msrb.mxu1 %v3851_v57  ;;  %v3800_v57 = vld [vmem:[#allocation5 + $0x3cc] sm:$0xf0]  ;;  %v2692_v3 = vpop.f32.mrf.mxu1 }
  0xbf   :  { %2957 = vmatpush.bf16.msrb.mxu2 %v3947_v58  ;;  %v4996_v58 = vld [vmem:[#allocation5 + $0x484] sm:$0xf]  ;;  %v2705_v4 = vpop.f32.mrf.mxu2  ;;  %v3803_v10 = vor.u32 %v4972_v56, %v3800_v57  ;;  %v4151_v56 = vor.u32 %v5059_v45, %v4148_v47  ;;  %v5122_v47 = vld [vmem:[#allocation5 + $0x874] sm:$0xf] }
  0xc0   :  { %2970 = vmatpush.bf16.msrb.mxu3 %v4043_v62  ;;  %v3992_v62 = vld [vmem:[#allocation5 + $0x54c] sm:$0xf0]  ;;  %v3899_v11 = vor.u32 %v4996_v58, %v3896_v60  ;;  %v5128_v3 = vld [vmem:[#allocation5 + $0x8a4] sm:$0xf] }
  0xc1   :  { %2932 = vmatpush.bf16.msrb.mxu0 %v3743_v5  ;;  %v3707_v5 = vor.u32 %v4948_v51, %v3704_v52  ;;  %v3995_v15 = vor.u32 %v5020_v61, %v3992_v62  ;;  %v4244_v51 = vld [vmem:[#allocation5 + $0x744] sm:$0xf0]  ;;  %v5107_v52 = vld [vmem:[#allocation5 + $0x7fc] sm:$0xf]  ;;  %v4136_v60 = vld [vmem:[#allocation5 + $0x66c] sm:$0xf0] }
  0xc2   :  { %2945 = vmatpush.bf16.msrb.mxu1 %v3839_v7  ;;  %v5113_v7 = vld [vmem:[#allocation5 + $0x82c] sm:$0xf]  ;;  %v4247_v57 = vor.u32 %v5083_v48, %v4244_v51  ;;  %v4343_v58 = vor.u32 %v5107_v52, %v4340_v53  ;;  %v5080_v61 = vld [vmem:[#allocation5 + $0x724] sm:$0xf]  ;;  %v4424_v4 = vld [vmem:[#allocation5 + $0x8ac] sm:$0xf0] }
  0xc3   :  { %2958 = vmatpush.bf16.msrb.mxu2 %v3935_v8  ;;  %v4364_v8 = vld [vmem:[#allocation5 + $0x834] sm:$0xf0]  ;;  %v4400_v48 = vld [vmem:[#allocation5 + $0x87c] sm:$0xf0] }
  0xc4   :  { %2971 = vmatpush.bf16.msrb.mxu3 %v4031_v14  ;;  %v4460_v14 = vld [vmem:[#allocation5 + $0x8f4] sm:$0xf0]  ;;  %v4367_v25 = vor.u32 %v5113_v7, %v4364_v8  ;;  %v4235_v7 = vor.u32 %v5080_v61, %v4232_v0  ;;  %v4331_v8 = vor.u32 %v5104_v1, %v4328_v2  ;;  %v4292_v61 = vld [vmem:[#allocation5 + $0x7a4] sm:$0xf0]  ;;  %v5044_v2 = vld [vmem:[#allocation5 + $0x604] sm:$0xf] }
  0xc5   :  { %2933 = vmatpush.bf16.msrb.mxu0 %v3731_v31  ;;  %v2718_v31 = vpop.f32.mrf.mxu3  ;;  %v4463_v32 = vor.u32 %v5137_v12, %v4460_v14  ;;  %v5077_v12 = vld [vmem:[#allocation5 + $0x70c] sm:$0xf]  ;;  %v4388_v0 = vld [vmem:[#allocation5 + $0x864] sm:$0xf0] }
  0xc6   :  { %2946 = vmatpush.bf16.msrb.mxu1 %v3827_v33  ;;  %v4256_v33 = vld [vmem:[#allocation5 + $0x75c] sm:$0xf0] }
  0xc7   :  { %2959 = vmatpush.bf16.msrb.mxu2 %v3923_v35  ;;  %v5110_v35 = vld [vmem:[#allocation5 + $0x814] sm:$0xf]  ;;  %v4259_v43 = vor.u32 %v5086_v30, %v4256_v33 }
  0xc8   :  { %2972 = vmatpush.bf16.msrb.mxu3 %v4019_v42  ;;  %v4163_v42 = vor.u32 %v5062_v28, %v4160_v29  ;;  %v4355_v44 = vor.u32 %v5110_v35, %v4352_v36  ;;  %v5125_v28 = vld [vmem:[#allocation5 + $0x88c] sm:$0xf]  ;;  %v4412_v29 = vld [vmem:[#allocation5 + $0x894] sm:$0xf0]  ;;  %v5050_v33 = vld [vmem:[#allocation5 + $0x634] sm:$0xf] }
  0xc9   :  { %2934 = vmatpush.bf16.msrb.mxu0 %v3719_v50  ;;  %v4451_v50 = vor.u32 %v5134_v39, %v4448_v41  ;;  %v4112_v35 = vld [vmem:[#allocation5 + $0x63c] sm:$0xf0]  ;;  %v5074_v36 = vld [vmem:[#allocation5 + $0x6f4] sm:$0xf]  ;;  %v4415_v41 = vor.u32 %v5125_v28, %v4412_v29  ;;  %v5161_v28 = vld [vmem:[#allocation5 + $0x9ac] sm:$0xf] }
  0xca   :  { %2947 = vmatpush.bf16.msrb.mxu1 %v3815_v54  ;;  %v5131_v54 = vld [vmem:[#allocation5 + $0x8bc] sm:$0xf]  ;;  %v4556_v29 = vld [vmem:[#allocation5 + $0x9b4] sm:$0xf0] }
  0xcb   :  { %2960 = vmatpush.bf16.msrb.mxu2 %v3911_v55  ;;  %v4436_v55 = vld [vmem:[#allocation5 + $0x8c4] sm:$0xf0] }
  0xcc   :  { %2973 = vmatpush.bf16.msrb.mxu3 %v4007_v59  ;;  %v5056_v59 = vld [vmem:[#allocation5 + $0x664] sm:$0xf]  ;;  %v4439_v62 = vor.u32 %v5131_v54, %v4436_v55  ;;  %v5047_v54 = vld [vmem:[#allocation5 + $0x61c] sm:$0xf]  ;;  %v4100_v55 = vld [vmem:[#allocation5 + $0x624] sm:$0xf0] }
  0xcd   :  { %2935 = vmatpush.bf16.msrb.mxu0 %v3707_v5  ;;  %v4139_v5 = vor.u32 %v5056_v59, %v4136_v60  ;;  %v5440_v6 = vpop.f32.mrf.mxu0  ;;  %v4196_v59 = vld [vmem:[#allocation5 + $0x6e4] sm:$0xf0]  ;;  %v5095_v60 = vld [vmem:[#allocation5 + $0x79c] sm:$0xf]  ;;  %v4103_v1 = vor.u32 %v5047_v54, %v4100_v55  ;;  %v4640_v55 = vld [vmem:[#allocation5 + $0xa5c] sm:$0xf0] }
  0xce   :  { %2948 = vmatpush.bf16.msrb.mxu1 %v3803_v10  ;;  %v5053_v10 = vld [vmem:[#allocation5 + $0x64c] sm:$0xf]  ;;  %v5442_v14 = vpop.f32.mrf.mxu1 }
  0xcf   :  { %2961 = vmatpush.bf16.msrb.mxu2 %v3899_v11  ;;  %v4124_v11 = vld [vmem:[#allocation5 + $0x654] sm:$0xf0] }
  0xd0   :  { %2974 = vmatpush.bf16.msrb.mxu3 %v3995_v15  ;;  %2936 = vmatmul.bf16.vlgmr.msrb.gmra.mxu0 %v5394_v37  ;;  %v4427_v15 = vor.u32 %v5128_v3, %v4424_v4  ;;  %v4127_v30 = vor.u32 %v5053_v10, %v4124_v11  ;;  %v4088_v3 = vld [vmem:[#allocation5 + $0x60c] sm:$0xf0]  ;;  %v5092_v10 = vld [vmem:[#allocation5 + $0x784] sm:$0xf] }
  0xd1   :  { %2980 = vmatpush.bf16.msra.mxu0 %v4175_v18  ;;  %2949 = vmatmul.bf16.vlgmr.msrb.gmra.mxu1 %v5398_v40  ;;  %v4220_v18 = vld [vmem:[#allocation5 + $0x714] sm:$0xf0] }
  0xd2   :  { %2993 = vmatpush.bf16.msra.mxu1 %v4271_v22  ;;  %2962 = vmatmul.bf16.vlgmr.msrb.gmra.mxu2 %v5392_v34  ;;  %v5101_v22 = vld [vmem:[#allocation5 + $0x7cc] sm:$0xf]  ;;  %v4223_v31 = vor.u32 %v5077_v12, %v4220_v18  ;;  %v5116_v18 = vld [vmem:[#allocation5 + $0x844] sm:$0xf] }
  0xd3   :  { %3006 = vmatpush.bf16.msra.mxu2 %v4367_v25  ;;  %2975 = vmatmul.bf16.vlgmr.msrb.gmra.mxu3 %v5396_v38  ;;  %v4316_v25 = vld [vmem:[#allocation5 + $0x7d4] sm:$0xf0] }
  0xd4   :  { %3019 = vmatpush.bf16.msra.mxu3 %v4463_v32  ;;  %v4319_v32 = vor.u32 %v5101_v22, %v4316_v25  ;;  %v4376_v22 = vld [vmem:[#allocation5 + $0x84c] sm:$0xf0] }
  0xd5   :  { %2981 = vmatpush.bf16.msra.mxu0 %v4163_v42  ;;  %v5444_v39 = vpop.f32.mrf.mxu2  ;;  %v4208_v42 = vld [vmem:[#allocation5 + $0x6fc] sm:$0xf0]  ;;  %v2731_v51 = vpop.f32.mrf.mxu0 }
  0xd6   :  { %2994 = vmatpush.bf16.msra.mxu1 %v4259_v43  ;;  %v5098_v43 = vld [vmem:[#allocation5 + $0x7b4] sm:$0xf]  ;;  %v5446_v45 = vpop.f32.mrf.mxu3  ;;  %v4211_v52 = vor.u32 %v5074_v36, %v4208_v42  ;;  %v5233_v42 = vld [vmem:[#allocation5 + $0xbec] sm:$0xf] }
  0xd7   :  { %3007 = vmatpush.bf16.msra.mxu2 %v4355_v44  ;;  %v4304_v44 = vld [vmem:[#allocation5 + $0x7bc] sm:$0xf0]  ;;  %v5158_v51 = vld [vmem:[#allocation5 + $0x994] sm:$0xf] }
  0xd8   :  { %3020 = vmatpush.bf16.msra.mxu3 %v4451_v50  ;;  %v4115_v50 = vor.u32 %v5050_v33, %v4112_v35  ;;  %v4307_v53 = vor.u32 %v5098_v43, %v4304_v44  ;;  %v5209_v33 = vld [vmem:[#allocation5 + $0xb2c] sm:$0xf]  ;;  %v4748_v35 = vld [vmem:[#allocation5 + $0xb34] sm:$0xf0]  ;;  %v4379_v44 = vor.u32 %v5116_v18, %v4376_v22  ;;  %v5152_v18 = vld [vmem:[#allocation5 + $0x964] sm:$0xf] }
  0xd9   :  { %2982 = vmatpush.bf16.msra.mxu0 %v4151_v56  ;;  %v5071_v56 = vld [vmem:[#allocation5 + $0x6dc] sm:$0xf]  ;;  %v4844_v43 = vld [vmem:[#allocation5 + $0xbf4] sm:$0xf0]  ;;  %v4520_v22 = vld [vmem:[#allocation5 + $0x96c] sm:$0xf0] }
  0xda   :  { %2995 = vmatpush.bf16.msra.mxu1 %v4247_v57  ;;  %v2744_v57 = vpop.f32.mrf.mxu1  ;;  %v4199_v4 = vor.u32 %v5071_v56, %v4196_v59  ;;  %v4847_v54 = vor.u32 %v5233_v42, %v4844_v43  ;;  %v5206_v56 = vld [vmem:[#allocation5 + $0xb14] sm:$0xf]  ;;  %v4832_v59 = vld [vmem:[#allocation5 + $0xbdc] sm:$0xf0]  ;;  %v2717_v42 = vadd.f32 %v5434_v49, %v5432_v46 }
  0xdb   :  { %3008 = vmatpush.bf16.msra.mxu2 %v4343_v58  ;;  %v4403_v58 = vor.u32 %v5122_v47, %v4400_v48  ;;  %v4559_v47 = vor.u32 %v5161_v28, %v4556_v29  ;;  %v4736_v57 = vld [vmem:[#allocation5 + $0xb1c] sm:$0xf0]  ;;  %v4616_v29 = vld [vmem:[#allocation5 + $0xa2c] sm:$0xf0] }
  0xdc   :  { %3021 = vmatpush.bf16.msra.mxu3 %v4439_v62  ;;  %v5119_v62 = vld [vmem:[#allocation5 + $0x85c] sm:$0xf] }
  0xdd   :  { %2983 = vmatpush.bf16.msra.mxu0 %v4139_v5  ;;  %v4295_v5 = vor.u32 %v5095_v60, %v4292_v61  ;;  %v2757_v11 = vpop.f32.mrf.mxu2  ;;  %v4391_v12 = vor.u32 %v5119_v62, %v4388_v0  ;;  %v4739_v62 = vor.u32 %v5206_v56, %v4736_v57  ;;  %v5155_v0 = vld [vmem:[#allocation5 + $0x97c] sm:$0xf]  ;;  %v4796_v56 = vld [vmem:[#allocation5 + $0xb94] sm:$0xf0] }
  0xde   :  { %2996 = vmatpush.bf16.msra.mxu1 %v4235_v7  ;;  %v5068_v7 = vld [vmem:[#allocation5 + $0x6c4] sm:$0xf]  ;;  %v2770_v25 = vpop.f32.mrf.mxu3 }
  0xdf   :  { %3009 = vmatpush.bf16.msra.mxu2 %v4331_v8  ;;  %v4184_v8 = vld [vmem:[#allocation5 + $0x6cc] sm:$0xf0]  ;;  %v5176_v25 = vld [vmem:[#allocation5 + $0xa24] sm:$0xf] }
  0xe0   :  { %3022 = vmatpush.bf16.msra.mxu3 %v4427_v15  ;;  %v4280_v15 = vld [vmem:[#allocation5 + $0x78c] sm:$0xf0]  ;;  %v4187_v36 = vor.u32 %v5068_v7, %v4184_v8  ;;  %v4724_v7 = vld [vmem:[#allocation5 + $0xb04] sm:$0xf0]  ;;  %v5227_v8 = vld [vmem:[#allocation5 + $0xbbc] sm:$0xf]  ;;  %v4619_v43 = vor.u32 %v5176_v25, %v4616_v29 }
  0xe1   :  { %2984 = vmatpush.bf16.msra.mxu0 %v4127_v30  ;;  %v5185_v30 = vld [vmem:[#allocation5 + $0xa6c] sm:$0xf]  ;;  %v5167_v25 = vld [vmem:[#allocation5 + $0x9dc] sm:$0xf]  ;;  %v4580_v29 = vld [vmem:[#allocation5 + $0x9e4] sm:$0xf0] }
  0xe2   :  { %2997 = vmatpush.bf16.msra.mxu1 %v4223_v31  ;;  %v4091_v31 = vor.u32 %v5044_v2, %v4088_v3  ;;  %v5179_v2 = vld [vmem:[#allocation5 + $0xa3c] sm:$0xf] }
  0xe3   :  { %3010 = vmatpush.bf16.msra.mxu2 %v4319_v32  ;;  %v4652_v32 = vld [vmem:[#allocation5 + $0xa74] sm:$0xf0] }
  0xe4   :  { %3023 = vmatpush.bf16.msra.mxu3 %v4415_v41  ;;  %v4283_v41 = vor.u32 %v5092_v10, %v4280_v15  ;;  %v4655_v48 = vor.u32 %v5185_v30, %v4652_v32  ;;  %v4820_v10 = vld [vmem:[#allocation5 + $0xbc4] sm:$0xf0]  ;;  %v5200_v30 = vld [vmem:[#allocation5 + $0xae4] sm:$0xf] }
  0xe5   :  { %2985 = vmatpush.bf16.msra.mxu0 %v4115_v50  ;;  %v4751_v50 = vor.u32 %v5209_v33, %v4748_v35  ;;  %v4823_v28 = vor.u32 %v5227_v8, %v4820_v10  ;;  %v5224_v33 = vld [vmem:[#allocation5 + $0xba4] sm:$0xf]  ;;  %v4808_v35 = vld [vmem:[#allocation5 + $0xbac] sm:$0xf0] }
  0xe6   :  { %2998 = vmatpush.bf16.msra.mxu1 %v4211_v52  ;;  %v4544_v52 = vld [vmem:[#allocation5 + $0x99c] sm:$0xf0] }
  0xe7   :  { %3011 = vmatpush.bf16.msra.mxu2 %v4307_v53  ;;  %v5182_v53 = vld [vmem:[#allocation5 + $0xa54] sm:$0xf]  ;;  %v4547_v60 = vor.u32 %v5158_v51, %v4544_v52  ;;  %v4811_v51 = vor.u32 %v5224_v33, %v4808_v35  ;;  %v4604_v52 = vld [vmem:[#allocation5 + $0xa14] sm:$0xf0]  ;;  %v5215_v33 = vld [vmem:[#allocation5 + $0xb5c] sm:$0xf] }
  0xe8   :  { %3024 = vmatpush.bf16.msra.mxu3 %v4403_v58  ;;  %v5230_v58 = vld [vmem:[#allocation5 + $0xbd4] sm:$0xf]  ;;  %v4643_v61 = vor.u32 %v5182_v53, %v4640_v55  ;;  %v5197_v53 = vld [vmem:[#allocation5 + $0xacc] sm:$0xf]  ;;  %v4772_v35 = vld [vmem:[#allocation5 + $0xb64] sm:$0xf0] }
  0xe9   :  { %2986 = vmatpush.bf16.msra.mxu0 %v4103_v1  ;;  %v4532_v1 = vld [vmem:[#allocation5 + $0x984] sm:$0xf0]  ;;  %v4835_v3 = vor.u32 %v5230_v58, %v4832_v59  ;;  %v5221_v55 = vld [vmem:[#allocation5 + $0xb8c] sm:$0xf]  ;;  %v2730_v58 = vadd.f32 %v5440_v6, %v2717_v42  ;;  %v5146_v59 = vld [vmem:[#allocation5 + $0x934] sm:$0xf] }
  0xea   :  { %2999 = vmatpush.bf16.msra.mxu1 %v4199_v4  ;;  %v4628_v4 = vld [vmem:[#allocation5 + $0xa44] sm:$0xf0]  ;;  %v4535_v11 = vor.u32 %v5155_v0, %v4532_v1  ;;  %v4592_v1 = vld [vmem:[#allocation5 + $0x9fc] sm:$0xf0]  ;;  %v5140_v42 = vld [vmem:[#allocation5 + $0x904] sm:$0xf] }
  0xeb   :  { %3012 = vmatpush.bf16.msra.mxu2 %v4295_v5  ;;  %v5203_v5 = vld [vmem:[#allocation5 + $0xafc] sm:$0xf] }
  0xec   :  { %3025 = vmatpush.bf16.msra.mxu3 %v4391_v12  ;;  %v4631_v12 = vor.u32 %v5179_v2, %v4628_v4  ;;  %v4727_v15 = vor.u32 %v5203_v5, %v4724_v7  ;;  %v5194_v2 = vld [vmem:[#allocation5 + $0xab4] sm:$0xf]  ;;  %v4784_v7 = vld [vmem:[#allocation5 + $0xb7c] sm:$0xf0] }
  0xed   :  { %2987 = vmatpush.bf16.msra.mxu0 %v4091_v31  ;;  %v4712_v31 = vld [vmem:[#allocation5 + $0xaec] sm:$0xf0]  ;;  %v5452_v32 = vpop.f32.mrf.mxu0  ;;  %v5218_v5 = vld [vmem:[#allocation5 + $0xb74] sm:$0xf] }
  0xee   :  { %3000 = vmatpush.bf16.msra.mxu1 %v4187_v36  ;;  %v4523_v36 = vor.u32 %v5152_v18, %v4520_v22  ;;  %v5143_v18 = vld [vmem:[#allocation5 + $0x91c] sm:$0xf]  ;;  %v4484_v22 = vld [vmem:[#allocation5 + $0x924] sm:$0xf0] }
  0xef   :  { %3013 = vmatpush.bf16.msra.mxu2 %v4283_v41  ;;  %v5454_v41 = vpop.f32.mrf.mxu1 }
  0xf0   :  { %3026 = vmatpush.bf16.msra.mxu3 %v4379_v44  ;;  %2988 = vmatmul.bf16.vlgmr.msra.gmra.mxu0 %v5404_v19  ;;  %v4715_v44 = vor.u32 %v5200_v30, %v4712_v31  ;;  %v5191_v30 = vld [vmem:[#allocation5 + $0xa9c] sm:$0xf]  ;;  %v4676_v31 = vld [vmem:[#allocation5 + $0xaa4] sm:$0xf0] }
  0xf1   :  { %3032 = vmatpush.bf16.msrb.mxu0 %v4559_v47  ;;  %3001 = vmatmul.bf16.vlgmr.msra.gmra.mxu1 %v5408_v24  ;;  %v5149_v47 = vld [vmem:[#allocation5 + $0x94c] sm:$0xf] }
  0xf2   :  { %3045 = vmatpush.bf16.msrb.mxu1 %v4655_v48  ;;  %3014 = vmatmul.bf16.vlgmr.msra.gmra.mxu2 %v5406_v23  ;;  %v4508_v48 = vld [vmem:[#allocation5 + $0x954] sm:$0xf0] }
  0xf3   :  { %3058 = vmatpush.bf16.msrb.mxu2 %v4751_v50  ;;  %3027 = vmatmul.bf16.vlgmr.msra.gmra.mxu3 %v5410_v27  ;;  %v5173_v50 = vld [vmem:[#allocation5 + $0xa0c] sm:$0xf]  ;;  %v4511_v57 = vor.u32 %v5149_v47, %v4508_v48  ;;  %v4679_v47 = vor.u32 %v5191_v30, %v4676_v31  ;;  %v5164_v48 = vld [vmem:[#allocation5 + $0x9c4] sm:$0xf] }
  0xf4   :  { %3071 = vmatpush.bf16.msrb.mxu3 %v4847_v54  ;;  %v4700_v54 = vld [vmem:[#allocation5 + $0xad4] sm:$0xf0]  ;;  %v4607_v46 = vor.u32 %v5173_v50, %v4604_v52  ;;  %v4568_v50 = vld [vmem:[#allocation5 + $0x9cc] sm:$0xf0]  ;;  %v4775_v52 = vor.u32 %v5215_v33, %v4772_v35  ;;  %v4944_v30 = vld [vmem:[#allocation5 + $0x2e0] sm:$0xf0] }
  0xf5   :  { %3033 = vmatpush.bf16.msrb.mxu0 %v4547_v60  ;;  %v4703_v49 = vor.u32 %v5197_v53, %v4700_v54  ;;  %v4496_v60 = vld [vmem:[#allocation5 + $0x93c] sm:$0xf0]  ;;  %v5459_v0 = vpop.f32.mrf.mxu2  ;;  %v2783_v8 = vpop.f32.mrf.mxu0  ;;  %v4664_v53 = vld [vmem:[#allocation5 + $0xa8c] sm:$0xf0]  ;;  %v5212_v54 = vld [vmem:[#allocation5 + $0xb44] sm:$0xf] }
  0xf6   :  { %3046 = vmatpush.bf16.msrb.mxu1 %v4643_v61  ;;  %v5170_v61 = vld [vmem:[#allocation5 + $0x9f4] sm:$0xf]  ;;  %v5461_v4 = vpop.f32.mrf.mxu3  ;;  %v4499_v6 = vor.u32 %v5146_v59, %v4496_v60  ;;  %v3602_v60 = vld [vmem:[#allocation5 + $0x230] sm:$0xf] }
  0xf7   :  { %3059 = vmatpush.bf16.msrb.mxu2 %v4739_v62  ;;  %v4799_v62 = vor.u32 %v5221_v55, %v4796_v56  ;;  %v2796_v10 = vpop.f32.mrf.mxu1  ;;  %v4760_v55 = vld [vmem:[#allocation5 + $0xb4c] sm:$0xf0] }
  0xf8   :  { %3072 = vmatpush.bf16.msrb.mxu3 %v4835_v3  ;;  %v4688_v3 = vld [vmem:[#allocation5 + $0xabc] sm:$0xf0] }
  0xf9   :  { %3034 = vmatpush.bf16.msrb.mxu0 %v4535_v11  ;;  %v2743_v11 = vadd.f32 %v5442_v14, %v2730_v58  ;;  %v4875_v58 = vld [vmem:[#allocation5 + $0xb8] sm:$0xf0] }
  0xfa   :  { %3047 = vmatpush.bf16.msrb.mxu1 %v4631_v12  ;;  %v4595_v12 = vor.u32 %v5170_v61, %v4592_v1  ;;  %v4923_v61 = vld [vmem:[#allocation5 + $0x238] sm:$0xf0]  ;;  %v4571_v1 = vor.u32 %v5164_v48, %v4568_v50  ;;  %v4917_v48 = vld [vmem:[#allocation5 + $0x208] sm:$0xf0] }
  0xfb   :  { %3060 = vmatpush.bf16.msrb.mxu2 %v4727_v15  ;;  %v4691_v15 = vor.u32 %v5194_v2, %v4688_v3  ;;  %v2756_v14 = vadd.f32 %v5444_v39, %v2743_v11  ;;  %v4899_v39 = vld [vmem:[#allocation5 + $0x178] sm:$0xf0]  ;;  %v3698_v3 = vld [vmem:[#allocation5 + $0x2f0] sm:$0xf]  ;;  %v3603_v11 = vor.u32 %v4923_v61, %v3602_v60  ;;  %v3662_v60 = vld [vmem:[#allocation5 + $0x2a8] sm:$0xf] }
  0xfc   :  { %3073 = vmatpush.bf16.msrb.mxu3 %v4823_v28  ;;  %v4787_v28 = vor.u32 %v5218_v5, %v4784_v7  ;;  %v4947_v5 = vld [vmem:[#allocation5 + $0x2f8] sm:$0xf0]  ;;  %v4763_v7 = vor.u32 %v5212_v54, %v4760_v55  ;;  %v3374_v55 = vld [vmem:[#allocation5 + $0x68] sm:$0xf]  ;;  %v4938_v61 = vld [vmem:[#allocation5 + $0x2b0] sm:$0xf0] }
  0xfd   :  { %3035 = vmatpush.bf16.msrb.mxu0 %v4523_v36  ;;  %v4487_v36 = vor.u32 %v5143_v18, %v4484_v22  ;;  %v2809_v56 = vpop.f32.mrf.mxu2  ;;  %v3494_v18 = vld [vmem:[#allocation5 + $0x158] sm:$0xf]  ;;  %v3699_v22 = vor.u32 %v4947_v5, %v3698_v3 }
  0xfe   :  { %3048 = vmatpush.bf16.msrb.mxu1 %v4619_v43  ;;  %v4472_v43 = vld [vmem:[#allocation5 + $0x90c] sm:$0xf0]  ;;  %v4866_v56 = vld [vmem:[#allocation5 + $0x70] sm:$0xf0] }
  0xff   :  { %3061 = vmatpush.bf16.msrb.mxu2 %v4715_v44  ;;  %v4583_v44 = vor.u32 %v5167_v25, %v4580_v29  ;;  %v4475_v59 = vor.u32 %v5140_v42, %v4472_v43  ;;  %v4896_v25 = vld [vmem:[#allocation5 + $0x160] sm:$0xf0]  ;;  %v3686_v29 = vld [vmem:[#allocation5 + $0x2d8] sm:$0xf]  ;;  %v4869_v42 = vld [vmem:[#allocation5 + $0x88] sm:$0xf0] }
 0x100   :  { %3074 = vmatpush.bf16.msrb.mxu3 %v4811_v51  ;;  %v5188_v51 = vld [vmem:[#allocation5 + $0xa84] sm:$0xf]  ;;  %v3482_v43 = vld [vmem:[#allocation5 + $0x140] sm:$0xf] }
 0x101   :  { %3036 = vmatpush.bf16.msrb.mxu0 %v4511_v57  ;;  %v3410_v57 = vld [vmem:[#allocation5 + $0xb0] sm:$0xf]  ;;  %v4667_v2 = vor.u32 %v5188_v51, %v4664_v53  ;;  %v4941_v51 = vld [vmem:[#allocation5 + $0x2c8] sm:$0xf0] }
 0x102   :  { %3049 = vmatpush.bf16.msrb.mxu1 %v4607_v46  ;;  %v3506_v46 = vld [vmem:[#allocation5 + $0x170] sm:$0xf]  ;;  %v3411_v8 = vor.u32 %v4875_v58, %v3410_v57  ;;  %v3470_v57 = vld [vmem:[#allocation5 + $0x128] sm:$0xf] }
 0x103   :  { %3062 = vmatpush.bf16.msrb.mxu2 %v4703_v49  ;;  %v2822_v49 = vpop.f32.mrf.mxu3  ;;  %v3507_v10 = vor.u32 %v4899_v39, %v3506_v46  ;;  %v3566_v46 = vld [vmem:[#allocation5 + $0x1e8] sm:$0xf] }
 0x104   :  { %3075 = vmatpush.bf16.msrb.mxu3 %v4799_v62  ;;  %v2769_v62 = vadd.f32 %v5446_v45, %v2756_v14  ;;  %v3590_v45 = vld [vmem:[#allocation5 + $0x218] sm:$0xf]  ;;  %v3687_v14 = vor.u32 %v4944_v30, %v3686_v29  ;;  %v4914_v49 = vld [vmem:[#allocation5 + $0x1f0] sm:$0xf0] }
 0x105   :  { %3037 = vmatpush.bf16.msrb.mxu0 %v4499_v6  ;;  %v3567_v5 = vor.u32 %v4914_v49, %v3566_v46  ;;  %v3350_v30 = vld [vmem:[#allocation5 + $0x38] sm:$0xf]  ;;  %v4881_v46 = vld [vmem:[#allocation5 + $0xe8] sm:$0xf0]  ;;  %v3530_v49 = vld [vmem:[#allocation5 + $0x1a0] sm:$0xf] }
 0x106   :  { %3050 = vmatpush.bf16.msrb.mxu1 %v4595_v12  ;;  %v2782_v6 = vadd.f32 %v5452_v32, %v2769_v62  ;;  %v3398_v12 = vld [vmem:[#allocation5 + $0x98] sm:$0xf]  ;;  %v3495_v32 = vor.u32 %v4896_v25, %v3494_v18  ;;  %v3375_v62 = vor.u32 %v4866_v56, %v3374_v55  ;;  %v4935_v18 = vld [vmem:[#allocation5 + $0x298] sm:$0xf0]  ;;  %v62_v25 = vld [vmem:[#allocation7] sm:$0x7] }
 0x107   :  { %3063 = vmatpush.bf16.msrb.mxu2 %v4691_v15  ;;  %v4872_v15 = vld [vmem:[#allocation5 + $0xa0] sm:$0xf0]  ;;  %v3338_v56 = vld [vmem:[#allocation5 + $0x20] sm:$0xf] }
 0x108   :  { %3076 = vmatpush.bf16.msrb.mxu3 %v4787_v28  ;;  %v4920_v28 = vld [vmem:[#allocation5 + $0x220] sm:$0xf0]  ;;  %v3399_v31 = vor.u32 %v4872_v15, %v3398_v12  ;;  %v2795_v33 = vadd.f32 %v5454_v41, %v2782_v6  ;;  %v3674_v41 = vld [vmem:[#allocation5 + $0x2c0] sm:$0xf]  ;;  %v3458_v6 = vld [vmem:[#allocation5 + $0x110] sm:$0xf] }
 0x109   :  { %3038 = vmatpush.bf16.msrb.mxu0 %v4487_v36  ;;  %v3591_v35 = vor.u32 %v4920_v28, %v3590_v45  ;;  %v3386_v36 = vld [vmem:[#allocation5 + $0x80] sm:$0xf]  ;;  %v3675_v58 = vor.u32 %v4941_v51, %v3674_v41  ;;  %v3554_v12 = vld [vmem:[#allocation5 + $0x1d0] sm:$0xf]  ;;  %v4911_v15 = vld [vmem:[#allocation5 + $0x1d8] sm:$0xf0] }
 0x10a   :  { %3051 = vmatpush.bf16.msrb.mxu1 %v4583_v44  ;;  %v4893_v44 = vld [vmem:[#allocation5 + $0x148] sm:$0xf0]  ;;  %v2808_v50 = vadd.f32 %v5459_v0, %v2795_v33  ;;  %v4890_v0 = vld [vmem:[#allocation5 + $0x130] sm:$0xf0]  ;;  %v3555_v29 = vor.u32 %v4911_v15, %v3554_v12  ;;  %v3446_v33 = vld [vmem:[#allocation5 + $0xf8] sm:$0xf] }
 0x10b   :  { %3064 = vmatpush.bf16.msrb.mxu2 %v4679_v47  ;;  %v3578_v47 = vld [vmem:[#allocation5 + $0x200] sm:$0xf]  ;;  %v3483_v53 = vor.u32 %v4893_v44, %v3482_v43  ;;  %v3471_v3 = vor.u32 %v4890_v0, %v3470_v57  ;;  %v4908_v43 = vld [vmem:[#allocation5 + $0x1c0] sm:$0xf0]  ;;  %v64_v44 = vperm.slane %v62_v25, 0 }
 0x10c   :  { %3077 = vmatpush.bf16.msrb.mxu3 %v4775_v52  ;;  %v3387_v52 = vor.u32 %v4869_v42, %v3386_v36  ;;  %v3579_v54 = vor.u32 %v4917_v48, %v3578_v47  ;;  %v4884_v36 = vld [vmem:[#allocation5 + $0x100] sm:$0xf0]  ;;  %v3542_v42 = vld [vmem:[#allocation5 + $0x1b8] sm:$0xf]  ;;  %v4857_v57 = vld [vmem:[#allocation5 + $0x28] sm:$0xf0] }
 0x10d   :  { %3039 = vmatpush.bf16.msrb.mxu0 %v4475_v59  ;;  %v2821_v59 = vadd.f32 %v5461_v4, %v2808_v50  ;;  %v2833_v39 = vpop.f32.mrf.mxu0  ;;  %v3650_v4 = vld [vmem:[#allocation5 + $0x290] sm:$0xf]  ;;  %v3638_v48 = vld [vmem:[#allocation5 + $0x278] sm:$0xf]  ;;  %v4932_v50 = vld [vmem:[#allocation5 + $0x280] sm:$0xf0]  ;;  %v3543_v55 = vor.u32 %v4908_v43, %v3542_v42 }
 0x10e   :  { %3052 = vmatpush.bf16.msrb.mxu1 %v4571_v1  ;;  %v2846_v1 = vpop.f32.mrf.mxu1  ;;  %v3639_v0 = vor.u32 %v4932_v50, %v3638_v48  ;;  %v3614_v12 = vld [vmem:[#allocation5 + $0x248] sm:$0xf]  ;;  %v4926_v15 = vld [vmem:[#allocation5 + $0x250] sm:$0xf0]  ;;  %v3890_v25 = vld [vmem:[#allocation5 + $0x470] sm:$0xf] }
 0x10f   :  { %3065 = vmatpush.bf16.msrb.mxu2 %v4667_v2  ;;  %v2834_v2 = vadd.f32 %v2833_v39, %v2821_v59  ;;  %v4905_v59 = vld [vmem:[#allocation5 + $0x1a8] sm:$0xf0]  ;;  %v3615_v42 = vor.u32 %v4926_v15, %v3614_v12  ;;  %v4968_v48 = vld [vmem:[#allocation5 + $0x3a0] sm:$0xf0]  ;;  %v3878_v50 = vld [vmem:[#allocation5 + $0x458] sm:$0xf] }
 0x110   :  { %3078 = vmatpush.bf16.msrb.mxu3 %v4763_v7  ;;  %3040 = vmatmul.bf16.vlgmr.msrb.gmra.mxu0 %v5416_v13  ;;  %v3362_v7 = vld [vmem:[#allocation5 + $0x50] sm:$0xf]  ;;  %v5010_v12 = vld [vmem:[#allocation5 + $0x4f0] sm:$0xf0]  ;;  %v4046_v15 = vld [vmem:[#allocation5 + $0x5a8] sm:$0xf] }
 0x111   :  { %3084 = vmatpush.bf16.msra.mxu0 %v3411_v8  ;;  %3053 = vmatmul.bf16.vlgmr.msrb.gmra.mxu1 %v5420_v21  ;;  %v4863_v8 = vld [vmem:[#allocation5 + $0x58] sm:$0xf0]  ;;  %v2847_v45 = vadd.f32 %v2846_v1, %v2834_v2  ;;  %v3326_v1 = vld [vmem:[#allocation5 + $0x8] sm:$0xf]  ;;  %v4854_v2 = vld [vmem:[#allocation5 + $0x10] sm:$0xf0] }
 0x112   :  { %3097 = vmatpush.bf16.msra.mxu1 %v3507_v10  ;;  %3066 = vmatmul.bf16.vlgmr.msrb.gmra.mxu2 %v5418_v20  ;;  %v3663_v10 = vor.u32 %v4938_v61, %v3662_v60  ;;  %v3626_v60 = vld [vmem:[#allocation5 + $0x260] sm:$0xf]  ;;  %v4929_v61 = vld [vmem:[#allocation5 + $0x268] sm:$0xf0] }
 0x113   :  { %3110 = vmatpush.bf16.msra.mxu2 %v3603_v11  ;;  %3079 = vmatmul.bf16.vlgmr.msrb.gmra.mxu3 %v5422_v26  ;;  %v4887_v11 = vld [vmem:[#allocation5 + $0x118] sm:$0xf0] }
 0x114   :  { %3123 = vmatpush.bf16.msra.mxu3 %v3699_v22  ;;  %v3363_v22 = vor.u32 %v4863_v8, %v3362_v7  ;;  %v3459_v28 = vor.u32 %v4887_v11, %v3458_v6  ;;  %v3531_v7 = vor.u32 %v4905_v59, %v3530_v49  ;;  %v4878_v8 = vld [vmem:[#allocation5 + $0xd0] sm:$0xf0]  ;;  %v3518_v6 = vld [vmem:[#allocation5 + $0x188] sm:$0xf]  ;;  %v3866_v49 = vld [vmem:[#allocation5 + $0x440] sm:$0xf] }
 0x115   :  { %3085 = vmatpush.bf16.msra.mxu0 %v3399_v31  ;;  %v4860_v31 = vld [vmem:[#allocation5 + $0x40] sm:$0xf0]  ;;  %v2835_v41 = vpop.f32.mrf.mxu0  ;;  %v4902_v11 = vld [vmem:[#allocation5 + $0x190] sm:$0xf0] }
 0x116   :  { %3098 = vmatpush.bf16.msra.mxu1 %v3495_v32  ;;  %v3651_v32 = vor.u32 %v4935_v18, %v3650_v4  ;;  %v2872_v47 = vpop.f32.mrf.mxu3  ;;  %v3351_v51 = vor.u32 %v4860_v31, %v3350_v30  ;;  %v3794_v18 = vld [vmem:[#allocation5 + $0x3b0] sm:$0xf]  ;;  %v5019_v31 = vld [vmem:[#allocation5 + $0x538] sm:$0xf0] }
 0x117   :  { %3111 = vmatpush.bf16.msra.mxu2 %v3591_v35  ;;  %v2859_v35 = vpop.f32.mrf.mxu2  ;;  %v3986_v30 = vld [vmem:[#allocation5 + $0x530] sm:$0xf] }
 0x118   :  { %3124 = vmatpush.bf16.msra.mxu3 %v3687_v14  ;;  %v2860_v14 = vadd.f32 %v2859_v35, %v2847_v45  ;;  %v4082_v35 = vld [vmem:[#allocation5 + $0x5f0] sm:$0xf] }
 0x119   :  { %3086 = vmatpush.bf16.msra.mxu0 %v3387_v52  ;;  %v2848_v52 = vpop.f32.mrf.mxu1 }
 0x11a   :  { %3099 = vmatpush.bf16.msra.mxu1 %v3483_v53  ;;  %v2873_v53 = vadd.f32 %v2872_v47, %v2860_v14  ;;  %v3782_v47 = vld [vmem:[#allocation5 + $0x398] sm:$0xf] }
 0x11b   :  { %3112 = vmatpush.bf16.msra.mxu2 %v3579_v54  ;;  %v3447_v54 = vor.u32 %v4884_v36, %v3446_v33  ;;  %v5043_v36 = vld [vmem:[#allocation5 + $0x5f8] sm:$0xf0]  ;;  %v3974_v52 = vld [vmem:[#allocation5 + $0x518] sm:$0xf] }
 0x11c   :  { %3125 = vmatpush.bf16.msra.mxu3 %v3675_v58  ;;  %v3434_v58 = vld [vmem:[#allocation5 + $0xe0] sm:$0xf]  ;;  %v3292_v39 = vadd.f32 %v2873_v53, %v64_v44  ;;  %v3987_v44 = vor.u32 %v5019_v31, %v3986_v30  ;;  %v4083_v41 = vor.u32 %v5043_v36, %v4082_v35  ;;  %v5016_v53 = vld [vmem:[#allocation5 + $0x520] sm:$0xf0]  ;;  %v4983_v30 = vld [vmem:[#allocation5 + $0x418] sm:$0xf0] }
 0x11d   :  { %3087 = vmatpush.bf16.msra.mxu0 %v3375_v62  ;;  %v3339_v62 = vor.u32 %v4857_v57, %v3338_v56  ;;  %v3783_v56 = vor.u32 %v4968_v48, %v3782_v47  ;;  %v3938_v31 = vld [vmem:[#allocation5 + $0x4d0] sm:$0xf]  ;;  %v5031_v36 = vld [vmem:[#allocation5 + $0x598] sm:$0xf0]  ;;  %v4956_v47 = vld [vmem:[#allocation5 + $0x340] sm:$0xf0] }
 0x11e   :  { %3100 = vmatpush.bf16.msra.mxu1 %v3471_v3  ;;  %v3422_v3 = vld [vmem:[#allocation5 + $0xc8] sm:$0xf]  ;;  %3295 = vst [vmem:[#allocation8] sm:$0xff] %v3292_v39  ;;  %v2874_v45 = vpop.f32.mrf.mxu3  ;;  %v4989_v39 = vld [vmem:[#allocation5 + $0x448] sm:$0xf0] }
 0x11f   :  { %3113 = vmatpush.bf16.msra.mxu2 %v3567_v5  ;;  %v3435_v5 = vor.u32 %v4881_v46, %v3434_v58  ;;  %v2861_v4 = vpop.f32.mrf.mxu2  ;;  %v3423_v33 = vor.u32 %v4878_v8, %v3422_v3  ;;  %v3975_v58 = vor.u32 %v5016_v53, %v3974_v52  ;;  %v4965_v46 = vld [vmem:[#allocation5 + $0x388] sm:$0xf0]  ;;  %v3867_v3 = vor.u32 %v4989_v39, %v3866_v49  ;;  %v4962_v8 = vld [vmem:[#allocation5 + $0x370] sm:$0xf0]  ;;  %v3842_v45 = vld [vmem:[#allocation5 + $0x410] sm:$0xf] }
 0x120   :  { %3126 = vmatpush.bf16.msra.mxu3 %v3663_v10  ;;  %v3627_v10 = vor.u32 %v4929_v61, %v3626_v60  ;;  %v3962_v60 = vld [vmem:[#allocation5 + $0x500] sm:$0xf]  ;;  %v5013_v61 = vld [vmem:[#allocation5 + $0x508] sm:$0xf0]  ;;  %v4034_v35 = vld [vmem:[#allocation5 + $0x590] sm:$0xf] }
 0x121   :  { %3088 = vmatpush.bf16.msra.mxu0 %v3363_v22  ;;  %v4971_v22 = vld [vmem:[#allocation5 + $0x3b8] sm:$0xf0]  ;;  %v3830_v48 = vld [vmem:[#allocation5 + $0x3f8] sm:$0xf]  ;;  %v5004_v53 = vld [vmem:[#allocation5 + $0x4c0] sm:$0xf0] }
 0x122   :  { %3101 = vmatpush.bf16.msra.mxu1 %v3459_v28  ;;  %v3327_v28 = vor.u32 %v4854_v2, %v3326_v1  ;;  %v3795_v43 = vor.u32 %v4971_v22, %v3794_v18  ;;  %v5037_v1 = vld [vmem:[#allocation5 + $0x5c8] sm:$0xf0]  ;;  %v3746_v22 = vld [vmem:[#allocation5 + $0x350] sm:$0xf]  ;;  %v3926_v52 = vld [vmem:[#allocation5 + $0x4b8] sm:$0xf] }
 0x123   :  { %3114 = vmatpush.bf16.msra.mxu2 %v3555_v29  ;;  %v4995_v29 = vld [vmem:[#allocation5 + $0x478] sm:$0xf0]  ;;  %v3722_v39 = vld [vmem:[#allocation5 + $0x320] sm:$0xf] }
 0x124   :  { %3127 = vmatpush.bf16.msra.mxu3 %v3651_v32  ;;  %v3519_v32 = vor.u32 %v4902_v11, %v3518_v6  ;;  %v3891_v14 = vor.u32 %v4995_v29, %v3890_v25  ;;  %v3854_v6 = vld [vmem:[#allocation5 + $0x428] sm:$0xf]  ;;  %v4959_v25 = vld [vmem:[#allocation5 + $0x358] sm:$0xf0] }
 0x125   :  { %3089 = vmatpush.bf16.msra.mxu0 %v3351_v51  ;;  %v4992_v51 = vld [vmem:[#allocation5 + $0x460] sm:$0xf0]  ;;  %v3950_v11 = vld [vmem:[#allocation5 + $0x4e8] sm:$0xf] }
 0x126   :  { %3102 = vmatpush.bf16.msra.mxu1 %v3447_v54  ;;  %v4070_v54 = vld [vmem:[#allocation5 + $0x5d8] sm:$0xf]  ;;  %v3879_v57 = vor.u32 %v4992_v51, %v3878_v50  ;;  %v3951_v18 = vor.u32 %v5010_v12, %v3950_v11  ;;  %v4980_v51 = vld [vmem:[#allocation5 + $0x400] sm:$0xf0] }
 0x127   :  { %3115 = vmatpush.bf16.msra.mxu2 %v3543_v55  ;;  %v5040_v55 = vld [vmem:[#allocation5 + $0x5e0] sm:$0xf0]  ;;  %v3831_v49 = vor.u32 %v4980_v51, %v3830_v48 }
 0x128   :  { %3128 = vmatpush.bf16.msra.mxu3 %v3639_v0  ;;  %v3770_v0 = vld [vmem:[#allocation5 + $0x380] sm:$0xf]  ;;  %v4071_v59 = vor.u32 %v5040_v55, %v4070_v54  ;;  %v5064_v51 = vld [vmem:[#allocation5 + $0x6a0] sm:$0xf0] }
 0x129   :  { %3090 = vmatpush.bf16.msra.mxu0 %v3339_v62  ;;  %v4058_v62 = vld [vmem:[#allocation5 + $0x5c0] sm:$0xf]  ;;  %v3771_v2 = vor.u32 %v4965_v46, %v3770_v0 }
 0x12a   :  { %3103 = vmatpush.bf16.msra.mxu1 %v3435_v5  ;;  %v3963_v5 = vor.u32 %v5013_v61, %v3962_v60  ;;  %v4953_v60 = vld [vmem:[#allocation5 + $0x328] sm:$0xf0]  ;;  %v3818_v61 = vld [vmem:[#allocation5 + $0x3e0] sm:$0xf] }
 0x12b   :  { %3116 = vmatpush.bf16.msra.mxu2 %v3531_v7  ;;  %v3758_v7 = vld [vmem:[#allocation5 + $0x368] sm:$0xf] }
 0x12c   :  { %3129 = vmatpush.bf16.msra.mxu3 %v3627_v10  ;;  %v4059_v10 = vor.u32 %v5037_v1, %v4058_v62 }
 0x12d   :  { %3091 = vmatpush.bf16.msra.mxu0 %v3327_v28  ;;  %v2885_v4 = vpop.f32.mrf.mxu0 }
 0x12e   :  { %3104 = vmatpush.bf16.msra.mxu1 %v3423_v33  ;;  %v2898_v28 = vpop.f32.mrf.mxu1  ;;  %v5007_v33 = vld [vmem:[#allocation5 + $0x4d8] sm:$0xf0] }
 0x12f   :  { %3117 = vmatpush.bf16.msra.mxu2 %v3519_v32  ;;  %v2899_v32 = vadd.f32 %v2898_v28, %v2885_v4  ;;  %v4178_v28 = vld [vmem:[#allocation5 + $0x6b0] sm:$0xf] }
 0x130   :  { %3130 = vmatpush.bf16.msra.mxu3 %v3615_v42  ;;  %3092 = vmatmul.bf16.vlgmr.msra.gmra.mxu0 %v5383_v9  ;;  %v5034_v9 = vld [vmem:[#allocation5 + $0x5b0] sm:$0xf0]  ;;  %v3747_v42 = vor.u32 %v4959_v25, %v3746_v22  ;;  %v3998_v22 = vld [vmem:[#allocation5 + $0x548] sm:$0xf] }
 0x131   :  { %3136 = vmatpush.bf16.msrb.mxu0 %v3795_v43  ;;  %3105 = vmatmul.bf16.vlgmr.msra.gmra.mxu1 %v5387_v17  ;;  %v4047_v29 = vor.u32 %v5034_v9, %v4046_v15  ;;  %v3843_v43 = vor.u32 %v4983_v30, %v3842_v45  ;;  %v3806_v15 = vld [vmem:[#allocation5 + $0x3c8] sm:$0xf]  ;;  %v4974_v9 = vld [vmem:[#allocation5 + $0x3d0] sm:$0xf0]  ;;  %v4274_v30 = vld [vmem:[#allocation5 + $0x770] sm:$0xf] }
 0x132   :  { %3149 = vmatpush.bf16.msrb.mxu1 %v3891_v14  ;;  %3118 = vmatmul.bf16.vlgmr.msra.gmra.mxu2 %v5380_v63  ;;  %v4986_v63 = vld [vmem:[#allocation5 + $0x430] sm:$0xf0]  ;;  %v3939_v14 = vor.u32 %v5007_v33, %v3938_v31  ;;  %v5091_v33 = vld [vmem:[#allocation5 + $0x778] sm:$0xf0] }
 0x133   :  { %3162 = vmatpush.bf16.msrb.mxu2 %v3987_v44  ;;  %3131 = vmatmul.bf16.vlgmr.msra.gmra.mxu3 %v5385_v16  ;;  %v3759_v16 = vor.u32 %v4962_v8, %v3758_v7  ;;  %v3855_v17 = vor.u32 %v4986_v63, %v3854_v6  ;;  %v3734_v44 = vld [vmem:[#allocation5 + $0x338] sm:$0xf]  ;;  %v4010_v7 = vld [vmem:[#allocation5 + $0x560] sm:$0xf]  ;;  %v5025_v8 = vld [vmem:[#allocation5 + $0x568] sm:$0xf0]  ;;  %v3723_v6 = vor.u32 %v4953_v60, %v3722_v39 }
 0x134   :  { %3175 = vmatpush.bf16.msrb.mxu3 %v4083_v41  ;;  %v4035_v41 = vor.u32 %v5031_v36, %v4034_v35  ;;  %v4950_v63 = vld [vmem:[#allocation5 + $0x310] sm:$0xf0]  ;;  %v5115_v35 = vld [vmem:[#allocation5 + $0x838] sm:$0xf0]  ;;  %v3807_v36 = vor.u32 %v4974_v9, %v3806_v15  ;;  %v4275_v48 = vor.u32 %v5091_v33, %v4274_v30  ;;  %v4154_v39 = vld [vmem:[#allocation5 + $0x680] sm:$0xf] }
 0x135   :  { %3137 = vmatpush.bf16.msrb.mxu0 %v3783_v56  ;;  %v2911_v50 = vpop.f32.mrf.mxu2  ;;  %v4022_v56 = vld [vmem:[#allocation5 + $0x578] sm:$0xf]  ;;  %v2887_v46 = vpop.f32.mrf.mxu0  ;;  %v5022_v25 = vld [vmem:[#allocation5 + $0x550] sm:$0xf0]  ;;  %v5061_v60 = vld [vmem:[#allocation5 + $0x688] sm:$0xf0] }
 0x136   :  { %3150 = vmatpush.bf16.msrb.mxu1 %v3879_v57  ;;  %v2912_v54 = vadd.f32 %v2911_v50, %v2899_v32  ;;  %v2924_v55 = vpop.f32.mrf.mxu3  ;;  %v5028_v57 = vld [vmem:[#allocation5 + $0x580] sm:$0xf0]  ;;  %v2900_v62 = vpop.f32.mrf.mxu1  ;;  %v4370_v32 = vld [vmem:[#allocation5 + $0x830] sm:$0xf]  ;;  %v5082_v15 = vld [vmem:[#allocation5 + $0x730] sm:$0xf0] }
 0x137   :  { %3163 = vmatpush.bf16.msrb.mxu2 %v3975_v58  ;;  %v3735_v58 = vor.u32 %v4956_v47, %v3734_v44  ;;  %v4023_v1 = vor.u32 %v5028_v57, %v4022_v56  ;;  %v3999_v44 = vor.u32 %v5022_v25, %v3998_v22  ;;  %v4371_v50 = vor.u32 %v5115_v35, %v4370_v32  ;;  %v5112_v56 = vld [vmem:[#allocation5 + $0x820] sm:$0xf0]  ;;  %v4454_v57 = vld [vmem:[#allocation5 + $0x8d8] sm:$0xf]  ;;  %v4334_v9 = vld [vmem:[#allocation5 + $0x7e8] sm:$0xf] }
 0x138   :  { %3176 = vmatpush.bf16.msrb.mxu3 %v4071_v59  ;;  %v5478_v0 = vadd.f32 %v2924_v55, %v2912_v54  ;;  %v3927_v59 = vor.u32 %v5004_v53, %v3926_v52  ;;  %v4262_v52 = vld [vmem:[#allocation5 + $0x758] sm:$0xf]  ;;  %v5088_v54 = vld [vmem:[#allocation5 + $0x760] sm:$0xf0]  ;;  %v4130_v22 = vld [vmem:[#allocation5 + $0x650] sm:$0xf] }
 0x139   :  { %3138 = vmatpush.bf16.msrb.mxu0 %v3771_v2  ;;  %v4977_v2 = vld [vmem:[#allocation5 + $0x3e8] sm:$0xf0]  ;;  %v4358_v55 = vld [vmem:[#allocation5 + $0x818] sm:$0xf]  ;;  %v5055_v25 = vld [vmem:[#allocation5 + $0x658] sm:$0xf0] }
 0x13a   :  { %3151 = vmatpush.bf16.msrb.mxu1 %v3867_v3  ;;  %v3914_v3 = vld [vmem:[#allocation5 + $0x4a0] sm:$0xf]  ;;  %v3819_v11 = vor.u32 %v4977_v2, %v3818_v61  ;;  %v5079_v30 = vld [vmem:[#allocation5 + $0x718] sm:$0xf0]  ;;  %v4418_v32 = vld [vmem:[#allocation5 + $0x890] sm:$0xf] }
 0x13b   :  { %3164 = vmatpush.bf16.msrb.mxu2 %v3963_v5  ;;  %v5001_v5 = vld [vmem:[#allocation5 + $0x4a8] sm:$0xf0]  ;;  %v4250_v61 = vld [vmem:[#allocation5 + $0x740] sm:$0xf]  ;;  %v5103_v33 = vld [vmem:[#allocation5 + $0x7d8] sm:$0xf0] }
 0x13c   :  { %3177 = vmatpush.bf16.msrb.mxu3 %v4059_v10  ;;  %v3710_v10 = vld [vmem:[#allocation5 + $0x308] sm:$0xf]  ;;  %v3915_v12 = vor.u32 %v5001_v5, %v3914_v3  ;;  %v4346_v2 = vld [vmem:[#allocation5 + $0x800] sm:$0xf]  ;;  %v5109_v3 = vld [vmem:[#allocation5 + $0x808] sm:$0xf0] }
 0x13d   :  { %3139 = vmatpush.bf16.msrb.mxu0 %v3759_v16  ;;  %v3902_v16 = vld [vmem:[#allocation5 + $0x488] sm:$0xf]  ;;  %v2913_v4 = vpop.f32.mrf.mxu2  ;;  %v3711_v31 = vor.u32 %v4950_v63, %v3710_v10  ;;  %v4442_v5 = vld [vmem:[#allocation5 + $0x8c0] sm:$0xf]  ;;  %v4347_v10 = vor.u32 %v5109_v3, %v4346_v2  ;;  %v5127_v35 = vld [vmem:[#allocation5 + $0x898] sm:$0xf0] }
 0x13e   :  { %3152 = vmatpush.bf16.msrb.mxu1 %v3855_v17  ;;  %v4011_v17 = vor.u32 %v5025_v8, %v4010_v7  ;;  %v2926_v45 = vpop.f32.mrf.mxu3  ;;  %v5133_v7 = vld [vmem:[#allocation5 + $0x8c8] sm:$0xf0]  ;;  %v4155_v8 = vor.u32 %v5061_v60, %v4154_v39  ;;  %v4142_v63 = vld [vmem:[#allocation5 + $0x668] sm:$0xf]  ;;  %v4202_v39 = vld [vmem:[#allocation5 + $0x6e0] sm:$0xf] }
 0x13f   :  { %3165 = vmatpush.bf16.msrb.mxu2 %v3951_v18  ;;  %v4998_v18 = vld [vmem:[#allocation5 + $0x490] sm:$0xf0]  ;;  %v4226_v45 = vld [vmem:[#allocation5 + $0x710] sm:$0xf]  ;;  %v5097_v2 = vld [vmem:[#allocation5 + $0x7a8] sm:$0xf0] }
 0x140   :  { %3178 = vmatpush.bf16.msrb.mxu3 %v4047_v29  ;;  %v5067_v29 = vld [vmem:[#allocation5 + $0x6b8] sm:$0xf0]  ;;  %v4394_v3 = vld [vmem:[#allocation5 + $0x860] sm:$0xf] }
 0x141   :  { %3140 = vmatpush.bf16.msrb.mxu0 %v3747_v42  ;;  %v3903_v42 = vor.u32 %v4998_v18, %v3902_v16  ;;  %v4179_v47 = vor.u32 %v5067_v29, %v4178_v28  ;;  %v4430_v16 = vld [vmem:[#allocation5 + $0x8a8] sm:$0xf] }
 0x142   :  { %3153 = vmatpush.bf16.msrb.mxu1 %v3843_v43  ;;  %v4466_v43 = vld [vmem:[#allocation5 + $0x8f0] sm:$0xf] }
 0x143   :  { %3166 = vmatpush.bf16.msrb.mxu2 %v3939_v14  ;;  %v5139_v14 = vld [vmem:[#allocation5 + $0x8f8] sm:$0xf0] }
 0x144   :  { %3179 = vmatpush.bf16.msrb.mxu3 %v4035_v41  ;;  %v4166_v41 = vld [vmem:[#allocation5 + $0x698] sm:$0xf]  ;;  %v4467_v53 = vor.u32 %v5139_v14, %v4466_v43 }
 0x145   :  { %3141 = vmatpush.bf16.msrb.mxu0 %v3735_v58  ;;  %v5136_v58 = vld [vmem:[#allocation5 + $0x8e0] sm:$0xf0]  ;;  %v4167_v46 = vor.u32 %v5064_v51, %v4166_v41  ;;  %v4118_v14 = vld [vmem:[#allocation5 + $0x638] sm:$0xf] }
 0x146   :  { %3154 = vmatpush.bf16.msrb.mxu1 %v3831_v49  ;;  %v4263_v49 = vor.u32 %v5088_v54, %v4262_v52  ;;  %v4455_v62 = vor.u32 %v5136_v58, %v4454_v57  ;;  %v5076_v41 = vld [vmem:[#allocation5 + $0x700] sm:$0xf0]  ;;  %v4310_v51 = vld [vmem:[#allocation5 + $0x7b8] sm:$0xf] }
 0x147   :  { %3167 = vmatpush.bf16.msrb.mxu2 %v3927_v59  ;;  %v4359_v59 = vor.u32 %v5112_v56, %v4358_v55  ;;  %v5100_v52 = vld [vmem:[#allocation5 + $0x7c0] sm:$0xf0]  ;;  %v4406_v54 = vld [vmem:[#allocation5 + $0x878] sm:$0xf] }
 0x148   :  { %3180 = vmatpush.bf16.msrb.mxu3 %v4023_v1  ;;  %v5085_v1 = vld [vmem:[#allocation5 + $0x748] sm:$0xf0]  ;;  %v5124_v55 = vld [vmem:[#allocation5 + $0x880] sm:$0xf0] }
 0x149   :  { %3142 = vmatpush.bf16.msrb.mxu0 %v3723_v6  ;;  %v4251_v6 = vor.u32 %v5085_v1, %v4250_v61  ;;  %v4407_v61 = vor.u32 %v5124_v55, %v4406_v54  ;;  %v4298_v1 = vld [vmem:[#allocation5 + $0x7a0] sm:$0xf]  ;;  %v5208_v54 = vld [vmem:[#allocation5 + $0xb20] sm:$0xf0]  ;;  %v4838_v55 = vld [vmem:[#allocation5 + $0xbd8] sm:$0xf] }
 0x14a   :  { %3155 = vmatpush.bf16.msrb.mxu1 %v3819_v11  ;;  %v5058_v11 = vld [vmem:[#allocation5 + $0x670] sm:$0xf0] }
 0x14b   :  { %3168 = vmatpush.bf16.msrb.mxu2 %v3915_v12  ;;  %v4443_v12 = vor.u32 %v5133_v7, %v4442_v5  ;;  %v4143_v4 = vor.u32 %v5058_v11, %v4142_v63  ;;  %v5121_v5 = vld [vmem:[#allocation5 + $0x868] sm:$0xf0]  ;;  %v4299_v63 = vor.u32 %v5097_v2, %v4298_v1  ;;  %v4190_v11 = vld [vmem:[#allocation5 + $0x6c8] sm:$0xf]  ;;  %v4826_v2 = vld [vmem:[#allocation5 + $0xbc0] sm:$0xf] }
 0x14c   :  { %3181 = vmatpush.bf16.msrb.mxu3 %v4011_v17  ;;  %v5205_v1 = vld [vmem:[#allocation5 + $0xb08] sm:$0xf0] }
 0x14d   :  { %3143 = vmatpush.bf16.msrb.mxu0 %v3711_v31  ;;  %v5484_v17 = vpop.f32.mrf.mxu0  ;;  %v4322_v31 = vld [vmem:[#allocation5 + $0x7d0] sm:$0xf] }
 0x14e   :  { %3156 = vmatpush.bf16.msrb.mxu1 %v3807_v36  ;;  %v5486_v28 = vpop.f32.mrf.mxu1  ;;  %v4131_v36 = vor.u32 %v5055_v25, %v4130_v22  ;;  %v4323_v43 = vor.u32 %v5103_v33, %v4322_v31  ;;  %v4658_v22 = vld [vmem:[#allocation5 + $0xa70] sm:$0xf] }
 0x14f   :  { %3169 = vmatpush.bf16.msrb.mxu2 %v3903_v42  ;;  %v4227_v42 = vor.u32 %v5079_v30, %v4226_v45  ;;  %v5187_v45 = vld [vmem:[#allocation5 + $0xa78] sm:$0xf0] }
 0x150   :  { %3182 = vmatpush.bf16.msrb.mxu3 %v3999_v44  ;;  %3144 = vmatmul.bf16.vlgmr.msrb.gmra.mxu0 %v5394_v37  ;;  %v5106_v37 = vld [vmem:[#allocation5 + $0x7f0] sm:$0xf0]  ;;  %v5052_v44 = vld [vmem:[#allocation5 + $0x640] sm:$0xf0]  ;;  %v5211_v30 = vld [vmem:[#allocation5 + $0xb38] sm:$0xf0] }
 0x151   :  { %3188 = vmatpush.bf16.msra.mxu0 %v4179_v47  ;;  %3157 = vmatmul.bf16.vlgmr.msrb.gmra.mxu1 %v5398_v40  ;;  %v4335_v18 = vor.u32 %v5106_v37, %v4334_v9  ;;  %v4214_v47 = vld [vmem:[#allocation5 + $0x6f8] sm:$0xf]  ;;  %v4119_v56 = vor.u32 %v5052_v44, %v4118_v14  ;;  %v4395_v9 = vor.u32 %v5121_v5, %v4394_v3  ;;  %v5094_v37 = vld [vmem:[#allocation5 + $0x790] sm:$0xf0]  ;;  %v5229_v3 = vld [vmem:[#allocation5 + $0xbc8] sm:$0xf0] }
 0x152   :  { %3201 = vmatpush.bf16.msra.mxu1 %v4275_v48  ;;  %3170 = vmatmul.bf16.vlgmr.msrb.gmra.mxu2 %v5392_v34  ;;  %v4238_v34 = vld [vmem:[#allocation5 + $0x728] sm:$0xf]  ;;  %v4215_v58 = vor.u32 %v5076_v41, %v4214_v47  ;;  %v4550_v44 = vld [vmem:[#allocation5 + $0x998] sm:$0xf]  ;;  %v5160_v47 = vld [vmem:[#allocation5 + $0x9a0] sm:$0xf0] }
 0x153   :  { %3214 = vmatpush.bf16.msra.mxu2 %v4371_v50  ;;  %3183 = vmatmul.bf16.vlgmr.msrb.gmra.mxu3 %v5396_v38  ;;  %v5130_v38 = vld [vmem:[#allocation5 + $0x8b0] sm:$0xf0]  ;;  %v4239_v40 = vor.u32 %v5082_v15, %v4238_v34  ;;  %v4419_v50 = vor.u32 %v5127_v35, %v4418_v32  ;;  %v4850_v32 = vld [vmem:[#allocation5 + $0xbf0] sm:$0xf]  ;;  %v5235_v35 = vld [vmem:[#allocation5 + $0xbf8] sm:$0xf0] }
 0x154   :  { %3227 = vmatpush.bf16.msra.mxu3 %v4467_v53  ;;  %v4431_v29 = vor.u32 %v5130_v38, %v4430_v16  ;;  %v5070_v34 = vld [vmem:[#allocation5 + $0x6d0] sm:$0xf0]  ;;  %v4382_v16 = vld [vmem:[#allocation5 + $0x848] sm:$0xf]  ;;  %v4851_v41 = vor.u32 %v5235_v35, %v4850_v32 }
 0x155   :  { %3189 = vmatpush.bf16.msra.mxu0 %v4167_v46  ;;  %v5488_v48 = vpop.f32.mrf.mxu2  ;;  %v2939_v57 = vpop.f32.mrf.mxu0  ;;  %v4311_v46 = vor.u32 %v5100_v52, %v4310_v51  ;;  %v5118_v38 = vld [vmem:[#allocation5 + $0x850] sm:$0xf0]  ;;  %v4191_v31 = vor.u32 %v5070_v34, %v4190_v11  ;;  %v5184_v51 = vld [vmem:[#allocation5 + $0xa60] sm:$0xf0]  ;;  %v4742_v52 = vld [vmem:[#allocation5 + $0xb18] sm:$0xf] }
 0x156   :  { %3202 = vmatpush.bf16.msra.mxu1 %v4263_v49  ;;  %v5490_v53 = vpop.f32.mrf.mxu3  ;;  %v4106_v49 = vld [vmem:[#allocation5 + $0x620] sm:$0xf]  ;;  %v2952_v60 = vpop.f32.mrf.mxu1  ;;  %v4551_v57 = vor.u32 %v5160_v47, %v4550_v44  ;;  %v5178_v11 = vld [vmem:[#allocation5 + $0xa30] sm:$0xf0]  ;;  %v4718_v34 = vld [vmem:[#allocation5 + $0xae8] sm:$0xf] }
 0x157   :  { %3215 = vmatpush.bf16.msra.mxu2 %v4359_v59  ;;  %v5049_v59 = vld [vmem:[#allocation5 + $0x628] sm:$0xf0]  ;;  %v5172_v47 = vld [vmem:[#allocation5 + $0xa00] sm:$0xf0] }
 0x158   :  { %3228 = vmatpush.bf16.msra.mxu3 %v4455_v62  ;;  %v5073_v62 = vld [vmem:[#allocation5 + $0x6e8] sm:$0xf0]  ;;  %v4107_v7 = vor.u32 %v5049_v59, %v4106_v49  ;;  %v4538_v49 = vld [vmem:[#allocation5 + $0x980] sm:$0xf] }
 0x159   :  { %3190 = vmatpush.bf16.msra.mxu0 %v4155_v8  ;;  %v4094_v8 = vld [vmem:[#allocation5 + $0x608] sm:$0xf]  ;;  %v5157_v59 = vld [vmem:[#allocation5 + $0x988] sm:$0xf0] }
 0x15a   :  { %3203 = vmatpush.bf16.msra.mxu1 %v4251_v6  ;;  %v5046_v6 = vld [vmem:[#allocation5 + $0x610] sm:$0xf0]  ;;  %v4539_v5 = vor.u32 %v5157_v59, %v4538_v49  ;;  %v5145_v49 = vld [vmem:[#allocation5 + $0x928] sm:$0xf0]  ;;  %v4586_v59 = vld [vmem:[#allocation5 + $0x9e0] sm:$0xf] }
 0x15b   :  { %3216 = vmatpush.bf16.msra.mxu2 %v4347_v10  ;;  %v4203_v10 = vor.u32 %v5073_v62, %v4202_v39  ;;  %v4095_v25 = vor.u32 %v5046_v6, %v4094_v8  ;;  %v4634_v39 = vld [vmem:[#allocation5 + $0xa40] sm:$0xf]  ;;  %v4526_v6 = vld [vmem:[#allocation5 + $0x968] sm:$0xf] }
 0x15c   :  { %3229 = vmatpush.bf16.msra.mxu3 %v4443_v12  ;;  %v4286_v12 = vld [vmem:[#allocation5 + $0x788] sm:$0xf]  ;;  %v4730_v62 = vld [vmem:[#allocation5 + $0xb00] sm:$0xf] }
 0x15d   :  { %3191 = vmatpush.bf16.msra.mxu0 %v4143_v4  ;;  %v2965_v15 = vpop.f32.mrf.mxu2  ;;  %v4287_v33 = vor.u32 %v5094_v37, %v4286_v12  ;;  %v4731_v8 = vor.u32 %v5205_v1, %v4730_v62  ;;  %v5193_v62 = vld [vmem:[#allocation5 + $0xaa8] sm:$0xf0]  ;;  %v4778_v1 = vld [vmem:[#allocation5 + $0xb60] sm:$0xf] }
 0x15e   :  { %3204 = vmatpush.bf16.msra.mxu1 %v4239_v40  ;;  %v2978_v4 = vpop.f32.mrf.mxu3  ;;  %v4562_v40 = vld [vmem:[#allocation5 + $0x9b0] sm:$0xf]  ;;  %v5226_v15 = vld [vmem:[#allocation5 + $0xbb0] sm:$0xf0] }
 0x15f   :  { %3217 = vmatpush.bf16.msra.mxu2 %v4335_v18  ;;  %v5163_v18 = vld [vmem:[#allocation5 + $0x9b8] sm:$0xf0] }
 0x160   :  { %3230 = vmatpush.bf16.msra.mxu3 %v4431_v29  ;;  %v4754_v29 = vld [vmem:[#allocation5 + $0xb30] sm:$0xf]  ;;  %v5151_v4 = vld [vmem:[#allocation5 + $0x958] sm:$0xf0] }
 0x161   :  { %3192 = vmatpush.bf16.msra.mxu0 %v4131_v36  ;;  %v4383_v36 = vor.u32 %v5118_v38, %v4382_v16  ;;  %v4755_v14 = vor.u32 %v5211_v30, %v4754_v29  ;;  %v4514_v38 = vld [vmem:[#allocation5 + $0x950] sm:$0xf]  ;;  %v5223_v30 = vld [vmem:[#allocation5 + $0xb98] sm:$0xf0] }
 0x162   :  { %3205 = vmatpush.bf16.msra.mxu1 %v4227_v42  ;;  %v4563_v42 = vor.u32 %v5163_v18, %v4562_v40  ;;  %v4610_v40 = vld [vmem:[#allocation5 + $0xa10] sm:$0xf] }
 0x163   :  { %3218 = vmatpush.bf16.msra.mxu2 %v4323_v43  ;;  %v4659_v43 = vor.u32 %v5187_v45, %v4658_v22  ;;  %v5175_v22 = vld [vmem:[#allocation5 + $0xa18] sm:$0xf0]  ;;  %v4802_v29 = vld [vmem:[#allocation5 + $0xb90] sm:$0xf] }
 0x164   :  { %3231 = vmatpush.bf16.msra.mxu3 %v4419_v50  ;;  %v4646_v50 = vld [vmem:[#allocation5 + $0xa58] sm:$0xf]  ;;  %v5199_v45 = vld [vmem:[#allocation5 + $0xad8] sm:$0xf0]  ;;  %v4611_v32 = vor.u32 %v5175_v22, %v4610_v40 }
 0x165   :  { %3193 = vmatpush.bf16.msra.mxu0 %v4119_v56  ;;  %v5232_v56 = vld [vmem:[#allocation5 + $0xbe0] sm:$0xf0] }
 0x166   :  { %3206 = vmatpush.bf16.msra.mxu1 %v4215_v58  ;;  %v4647_v58 = vor.u32 %v5184_v51, %v4646_v50  ;;  %v4839_v60 = vor.u32 %v5232_v56, %v4838_v55  ;;  %v4694_v50 = vld [vmem:[#allocation5 + $0xab8] sm:$0xf] }
 0x167   :  { %3219 = vmatpush.bf16.msra.mxu2 %v4311_v46  ;;  %v4743_v46 = vor.u32 %v5208_v54, %v4742_v52  ;;  %v4790_v52 = vld [vmem:[#allocation5 + $0xb78] sm:$0xf]  ;;  %v5220_v54 = vld [vmem:[#allocation5 + $0xb80] sm:$0xf0] }
 0x168   :  { %3232 = vmatpush.bf16.msra.mxu3 %v4407_v61  ;;  %v5181_v61 = vld [vmem:[#allocation5 + $0xa48] sm:$0xf0] }
 0x169   :  { %3194 = vmatpush.bf16.msra.mxu0 %v4107_v7  ;;  %v4635_v7 = vor.u32 %v5181_v61, %v4634_v39  ;;  %v4791_v39 = vor.u32 %v5220_v54, %v4790_v52  ;;  %v4682_v61 = vld [vmem:[#allocation5 + $0xaa0] sm:$0xf] }
 0x16a   :  { %3207 = vmatpush.bf16.msra.mxu1 %v4203_v10  ;;  %v4622_v10 = vld [vmem:[#allocation5 + $0xa28] sm:$0xf] }
 0x16b   :  { %3220 = vmatpush.bf16.msra.mxu2 %v4299_v63  ;;  %v4827_v63 = vor.u32 %v5229_v3, %v4826_v2  ;;  %v4623_v37 = vor.u32 %v5178_v11, %v4622_v10  ;;  %v5217_v2 = vld [vmem:[#allocation5 + $0xb68] sm:$0xf0]  ;;  %v4670_v11 = vld [vmem:[#allocation5 + $0xa88] sm:$0xf] }
 0x16c   :  { %3233 = vmatpush.bf16.msra.mxu3 %v4395_v9  ;;  %v4779_v10 = vor.u32 %v5217_v2, %v4778_v1 }
 0x16d   :  { %3195 = vmatpush.bf16.msra.mxu0 %v4095_v25  ;;  %v5496_v12 = vpop.f32.mrf.mxu0  ;;  %v4706_v25 = vld [vmem:[#allocation5 + $0xad0] sm:$0xf] }
 0x16e   :  { %3208 = vmatpush.bf16.msra.mxu1 %v4191_v31  ;;  %v5498_v9 = vpop.f32.mrf.mxu1  ;;  %v4515_v31 = vor.u32 %v5151_v4, %v4514_v38  ;;  %v4707_v35 = vor.u32 %v5199_v45, %v4706_v25 }
 0x16f   :  { %3221 = vmatpush.bf16.msra.mxu2 %v4287_v33  ;;  %v2938_v33 = vadd.f32 %v5484_v17, %v5478_v0 }
 0x170   :  { %3234 = vmatpush.bf16.msra.mxu3 %v4383_v36  ;;  %3196 = vmatmul.bf16.vlgmr.msra.gmra.mxu0 %v5404_v19  ;;  %v5154_v19 = vld [vmem:[#allocation5 + $0x970] sm:$0xf0]  ;;  %v4502_v36 = vld [vmem:[#allocation5 + $0x938] sm:$0xf] }
 0x171   :  { %3240 = vmatpush.bf16.msrb.mxu0 %v4563_v42  ;;  %3209 = vmatmul.bf16.vlgmr.msra.gmra.mxu1 %v5408_v24  ;;  %v4814_v24 = vld [vmem:[#allocation5 + $0xba8] sm:$0xf]  ;;  %v5148_v42 = vld [vmem:[#allocation5 + $0x940] sm:$0xf0]  ;;  %v2951_v56 = vadd.f32 %v5486_v28, %v2938_v33  ;;  %v5242_v33 = vld [vmem:[#allocation7] sm:$0x7] }
 0x172   :  { %3253 = vmatpush.bf16.msrb.mxu1 %v4659_v43  ;;  %3222 = vmatmul.bf16.vlgmr.msra.gmra.mxu2 %v5406_v23  ;;  %v5202_v23 = vld [vmem:[#allocation5 + $0xaf0] sm:$0xf0]  ;;  %v4815_v18 = vor.u32 %v5226_v15, %v4814_v24  ;;  %v4598_v43 = vld [vmem:[#allocation5 + $0x9f8] sm:$0xf]  ;;  %v4503_v0 = vor.u32 %v5148_v42, %v4502_v36  ;;  %v4766_v24 = vld [vmem:[#allocation5 + $0xb48] sm:$0xf] }
 0x173   :  { %3266 = vmatpush.bf16.msrb.mxu2 %v4755_v14  ;;  %3235 = vmatmul.bf16.vlgmr.msra.gmra.mxu3 %v5410_v27  ;;  %v4527_v27 = vor.u32 %v5154_v19, %v4526_v6  ;;  %v4719_v16 = vor.u32 %v5202_v23, %v4718_v34  ;;  %v4803_v14 = vor.u32 %v5223_v30, %v4802_v29  ;;  %v5142_v6 = vld [vmem:[#allocation5 + $0x910] sm:$0xf0]  ;;  %v4574_v19 = vld [vmem:[#allocation5 + $0x9c8] sm:$0xf] }
 0x174   :  { %3279 = vmatpush.bf16.msrb.mxu3 %v4851_v41  ;;  %v5196_v41 = vld [vmem:[#allocation5 + $0xac0] sm:$0xf0]  ;;  %v5190_v34 = vld [vmem:[#allocation5 + $0xa90] sm:$0xf0] }
 0x175   :  { %3241 = vmatpush.bf16.msrb.mxu0 %v4551_v57  ;;  %v5502_v44 = vpop.f32.mrf.mxu2  ;;  %v2991_v55 = vpop.f32.mrf.mxu0  ;;  %v4599_v57 = vor.u32 %v5172_v47, %v4598_v43  ;;  %v5214_v15 = vld [vmem:[#allocation5 + $0xb50] sm:$0xf0]  ;;  %v4671_v38 = vor.u32 %v5190_v34, %v4670_v11 }
 0x176   :  { %3254 = vmatpush.bf16.msrb.mxu1 %v4647_v58  ;;  %v3028_v51 = vpop.f32.mrf.mxu3  ;;  %v3004_v17 = vpop.f32.mrf.mxu1  ;;  %v4695_v58 = vor.u32 %v5196_v41, %v4694_v50  ;;  %v4767_v4 = vor.u32 %v5214_v15, %v4766_v24 }
 0x177   :  { %3267 = vmatpush.bf16.msrb.mxu2 %v4743_v46  ;;  %v4490_v46 = vld [vmem:[#allocation5 + $0x920] sm:$0xf] }
 0x178   :  { %3280 = vmatpush.bf16.msrb.mxu3 %v4839_v60  ;;  %v5169_v60 = vld [vmem:[#allocation5 + $0x9e8] sm:$0xf0]  ;;  %v4491_v3 = vor.u32 %v5145_v49, %v4490_v46 }
 0x179   :  { %3242 = vmatpush.bf16.msrb.mxu0 %v4539_v5  ;;  %v2964_v5 = vadd.f32 %v5488_v48, %v2951_v56  ;;  %v4587_v28 = vor.u32 %v5169_v60, %v4586_v59 }
 0x17a   :  { %3255 = vmatpush.bf16.msrb.mxu1 %v4635_v7  ;;  %v4683_v7 = vor.u32 %v5193_v62, %v4682_v61 }
 0x17b   :  { %3268 = vmatpush.bf16.msrb.mxu2 %v4731_v8  ;;  %v4478_v8 = vld [vmem:[#allocation5 + $0x908] sm:$0xf]  ;;  %v2977_v48 = vadd.f32 %v5490_v53, %v2964_v5 }
 0x17c   :  { %3281 = vmatpush.bf16.msrb.mxu3 %v4827_v63  ;;  %v5166_v63 = vld [vmem:[#allocation5 + $0x9d0] sm:$0xf0] }
 0x17d   :  { %3243 = vmatpush.bf16.msrb.mxu0 %v4527_v27  ;;  %v3017_v23 = vpop.f32.mrf.mxu2  ;;  %v2990_v40 = vadd.f32 %v5496_v12, %v2977_v48  ;;  %v66_v48 = vperm.slane %v5242_v33, 2 }
 0x17e   :  { %3256 = vmatpush.bf16.msrb.mxu1 %v4623_v37  ;;  %v3030_v27 = vpop.f32.mrf.mxu3  ;;  %v4479_v37 = vor.u32 %v5142_v6, %v4478_v8 }
 0x17f   :  { %3269 = vmatpush.bf16.msrb.mxu2 %v4719_v16  ;;  %v4575_v16 = vor.u32 %v5166_v63, %v4574_v19 }
 0x180   :  { %3282 = vmatpush.bf16.msrb.mxu3 %v4815_v18  ;;  %v3003_v18 = vadd.f32 %v5498_v9, %v2990_v40 }
 0x181   :  { %3244 = vmatpush.bf16.msrb.mxu0 %v4515_v31 }
 0x182   :  { %3257 = vmatpush.bf16.msrb.mxu1 %v4611_v32  ;;  %v3016_v53 = vadd.f32 %v5502_v44, %v3003_v18  ;;  %v65_v32 = vperm.slane %v5242_v33, 1 }
 0x183   :  { %3270 = vmatpush.bf16.msrb.mxu2 %v4707_v35 }
 0x184   :  { %3283 = vmatpush.bf16.msrb.mxu3 %v4803_v14  ;;  %v3029_v22 = vadd.f32 %v3028_v51, %v3016_v53 }
 0x185   :  { %3245 = vmatpush.bf16.msrb.mxu0 %v4503_v0 }
 0x186   :  { %3258 = vmatpush.bf16.msrb.mxu1 %v4599_v57 }
 0x187   :  { %3271 = vmatpush.bf16.msrb.mxu2 %v4695_v58 }
 0x188   :  { %3284 = vmatpush.bf16.msrb.mxu3 %v4791_v39 }
 0x189   :  { %3246 = vmatpush.bf16.msrb.mxu0 %v4491_v3 }
 0x18a   :  { %3259 = vmatpush.bf16.msrb.mxu1 %v4587_v28 }
 0x18b   :  { %3272 = vmatpush.bf16.msrb.mxu2 %v4683_v7 }
 0x18c   :  { %3285 = vmatpush.bf16.msrb.mxu3 %v4779_v10 }
 0x18d   :  { %3247 = vmatpush.bf16.msrb.mxu0 %v4479_v37  ;;  %v3041_v25 = vpop.f32.mrf.mxu0 }
 0x18e   :  { %3260 = vmatpush.bf16.msrb.mxu1 %v4575_v16  ;;  %v3054_v45 = vpop.f32.mrf.mxu1  ;;  %v3042_v12 = vadd.f32 %v3041_v25, %v3029_v22 }
 0x18f   :  { %3273 = vmatpush.bf16.msrb.mxu2 %v4671_v38 }
 0x190   :  { %3286 = vmatpush.bf16.msrb.mxu3 %v4767_v4  ;;  %3248 = vmatmul.bf16.vlgmr.msrb.gmra.mxu0 %v5416_v13  ;;  %v3055_v29 = vadd.f32 %v3054_v45, %v3042_v12 }
 0x191   :  { %3261 = vmatmul.bf16.vlgmr.msrb.gmra.mxu1 %v5420_v21 }
 0x192   :  { %3274 = vmatmul.bf16.vlgmr.msrb.gmra.mxu2 %v5418_v20 }
 0x193   :  { %3287 = vmatmul.bf16.vlgmr.msrb.gmra.mxu3 %v5422_v26 }
 0x195   :  { %v3067_v30 = vpop.f32.mrf.mxu2  ;;  %v3043_v35 = vpop.f32.mrf.mxu0 }
 0x196   :  { %v3068_v31 = vadd.f32 %v3067_v30, %v3055_v29  ;;  %v3080_v9 = vpop.f32.mrf.mxu3  ;;  %v3056_v13 = vpop.f32.mrf.mxu1 }
 0x198   :  { %v3081_v36 = vadd.f32 %v3080_v9, %v3068_v31 }
 0x19a   :  { %v3293_v21 = vadd.f32 %v3081_v36, %v65_v32 }
 0x19c   :  { %3296 = vst [vmem:[#allocation8 + $0x8] sm:$0xff] %v3293_v21 }
 0x19d   :  { %v3069_v20 = vpop.f32.mrf.mxu2 }
 0x19e   :  { %v3082_v42 = vpop.f32.mrf.mxu3 }
 0x1ad   :  { %v3093_v43 = vpop.f32.mrf.mxu0 }
 0x1ae   :  { %v3106_v14 = vpop.f32.mrf.mxu1 }
 0x1af   :  { %v3107_v26 = vadd.f32 %v3106_v14, %v3093_v43 }
 0x1b5   :  { %v3119_v44 = vpop.f32.mrf.mxu2  ;;  %v3095_v51 = vpop.f32.mrf.mxu0 }
 0x1b6   :  { %v3120_v47 = vadd.f32 %v3119_v44, %v3107_v26  ;;  %v3132_v50 = vpop.f32.mrf.mxu3  ;;  %v3108_v52 = vpop.f32.mrf.mxu1 }
 0x1b8   :  { %v3133_v41 = vadd.f32 %v3132_v50, %v3120_v47 }
 0x1bd   :  { %v3121_v54 = vpop.f32.mrf.mxu2 }
 0x1be   :  { %v3134_v55 = vpop.f32.mrf.mxu3 }
 0x1cd   :  { %v3145_v0 = vpop.f32.mrf.mxu0 }
 0x1ce   :  { %v3158_v17 = vpop.f32.mrf.mxu1  ;;  %v3146_v61 = vadd.f32 %v3145_v0, %v3133_v41 }
 0x1d0   :  { %v3159_v3 = vadd.f32 %v3158_v17, %v3146_v61 }
 0x1d5   :  { %v3171_v56 = vpop.f32.mrf.mxu2  ;;  %v3147_v58 = vpop.f32.mrf.mxu0 }
 0x1d6   :  { %v3184_v57 = vpop.f32.mrf.mxu3  ;;  %v3160_v46 = vpop.f32.mrf.mxu1  ;;  %v3172_v28 = vadd.f32 %v3171_v56, %v3159_v3 }
 0x1d8   :  { %v3185_v6 = vadd.f32 %v3184_v57, %v3172_v28 }
 0x1dd   :  { %v3173_v49 = vpop.f32.mrf.mxu2 }
 0x1de   :  { %v3186_v59 = vpop.f32.mrf.mxu3 }
 0x1ed   :  { %v3197_v39 = vpop.f32.mrf.mxu0 }
 0x1ee   :  { %v3210_v60 = vpop.f32.mrf.mxu1  ;;  %v3198_v19 = vadd.f32 %v3197_v39, %v3185_v6 }
 0x1f0   :  { %v3211_v10 = vadd.f32 %v3210_v60, %v3198_v19 }
 0x1f5   :  { %v3223_v62 = vpop.f32.mrf.mxu2  ;;  %v3199_v2 = vpop.f32.mrf.mxu0 }
 0x1f6   :  { %v3236_v1 = vpop.f32.mrf.mxu3  ;;  %v3212_v5 = vpop.f32.mrf.mxu1  ;;  %v3224_v63 = vadd.f32 %v3223_v62, %v3211_v10 }
 0x1f8   :  { %v3237_v11 = vadd.f32 %v3236_v1, %v3224_v63 }
 0x1fd   :  { %v3225_v7 = vpop.f32.mrf.mxu2 }
 0x1fe   :  { %v3238_v8 = vpop.f32.mrf.mxu3 }
 0x20d   :  { %v3249_v34 = vpop.f32.mrf.mxu0 }
 0x20e   :  { %v3262_v23 = vpop.f32.mrf.mxu1  ;;  %v3250_v24 = vadd.f32 %v3249_v34, %v3237_v11 }
 0x210   :  { %v3263_v15 = vadd.f32 %v3262_v23, %v3250_v24 }
 0x215   :  { %v3275_v27 = vpop.f32.mrf.mxu2  ;;  %v3251_v38 = vpop.f32.mrf.mxu0 }
 0x216   :  { %v3276_v37 = vadd.f32 %v3275_v27, %v3263_v15  ;;  %v3288_v16 = vpop.f32.mrf.mxu3  ;;  %v3264_v4 = vpop.f32.mrf.mxu1 }
 0x218   :  { %v3289_v40 = vadd.f32 %v3288_v16, %v3276_v37 }
 0x21a   :  { %v3294_v18 = vadd.f32 %v3289_v40, %v66_v48 }
 0x21c   :  { %3297 = vst [vmem:[#allocation8 + $0x10] sm:$0xff] %v3294_v18 }
 0x21d   :  { %v3277_v53 = vpop.f32.mrf.mxu2  ;;  %3308 = dma.vmem_to_hbm [thread:$0]  %s3304_s2, 384, %s3306_s30, [#allocation4]  }
 0x21e   :  { %v3290_v22 = vpop.f32.mrf.mxu3 }
 0x21f   :  { %5343 = dma.done.wait [#allocation4], 384  }
 0x220   :  { %5344 = vsyncadd [#allocation4], 4294966912 }
 0x221   :  { %3313 = vsyncpa [#allocation3], 1 }
 0x222   :  { %3314 = vsyncpa [#allocation6], 1 }
 0x223   :  { %3315 = vsyncpa [#allocation4], 1 }

</bundles_post_ra>
